<compile_context>
chip_gen: v6e
topology: v6e:2x2x1
jax: 0.10.0
libtpu: 0.0.40
codegen_flags: <defaults>
</compile_context>

<pallas_src>
import jax
import jax.numpy as jnp
from jax.experimental import pallas as pl
from jax.experimental.pallas import tpu as pltpu


# ----------------------------- config (small) -------------------------------
B = 2          # batch
S = 16         # seq len
NH = 4         # query heads
NKV = 2        # kv heads
HD = 32        # head dim
D = NH * HD    # model dim = 128
HID = 256      # ffn hidden dim
EPS = 1e-6
REP = NH // NKV
SCALE = HD ** -0.5

ROT_W = (NH + NKV) * HD          # 192: width of fused [Q | K] slab
QKV_W = 2 * ROT_W + NKV * HD     # 448: [Q | K | Q_swap | K_swap | V]
VOFF = 2 * ROT_W                 # 384: start of V columns


# ------------------------------ Pallas kernel -------------------------------
def transformer_block_kernel(
    x_ref,        # (B, S, D)      f32
    cos_ref,      # (S, ROT_W)     f32   per-head [cos | cos], tiled over Q+K heads
    sin_ref,      # (S, ROT_W)     f32   per-head [-sin | +sin] (sign baked in)
    mask_ref,     # (S, S)         f32
    wqkv_ref,     # (D, QKV_W)     bf16  [Wq*scale | Wk | Wq_swap*scale | Wk_swap | Wv]
    wo_ref,       # (NH*HD, D)     bf16
    w13_ref,      # (D, 2*HID)     bf16  [W1 | W3]
    w2_ref,       # (HID, D)       bf16
    anw_ref,      # (1, D)         f32   attention_norm weight
    fnw_ref,      # (1, D)         f32   ffn_norm weight
    out_ref,      # (B, S, D)      f32
    ctx_sc,       # (B*S, NH*HD)   f32   VMEM scratch for head-ordered context
):
    f32, bf16 = jnp.float32, jnp.bfloat16
    x = x_ref[...].reshape(B * S, D)                     # (32, 128) f32

    def rmsnorm(v, w):
        ms = jnp.mean(v * v, axis=-1, keepdims=True)
        return v * jax.lax.rsqrt(ms + EPS) * w           # w (1, D) broadcasts

    # ---------------- attention ----------------
    xn = rmsnorm(x, anw_ref[...])
    # single fused QKV(+swapped copies) matmul: (32,128) x (128,448)
    qkv = jnp.dot(xn.astype(bf16), wqkv_ref[...], preferred_element_type=f32)

    # slab-wide RoPE: rotate-half was pre-baked into the swapped weight columns,
    # so this is just two lane-dense FMAs on the 192-lane [Q|K] slab (f32 VPU).
    qk = qkv[:, :ROT_W].reshape(B, S, ROT_W)
    qk_sw = qkv[:, ROT_W:2 * ROT_W].reshape(B, S, ROT_W)
    qk_rot = (qk * cos_ref[...][None] + qk_sw * sin_ref[...][None]).astype(bf16)
    q3 = qk_rot[..., :NH * HD]                           # (B, S, 128)
    k3 = qk_rot[..., NH * HD:]                           # (B, S, 64)
    v3 = qkv[:, VOFF:].reshape(B, S, NKV * HD).astype(bf16)

    # causal mask tiled over the stacked REP query heads (rows are (r, s))
    mask = jnp.concatenate([mask_ref[...]] * REP, axis=0)[None]   # (1, REP*S, S)

    # One score matmul + one context matmul per KV group (REP q-heads stacked
    # along M). SCALE is already folded into the Q weight columns.
    for g in range(NKV):
        k_g = k3[..., g * HD:(g + 1) * HD]                         # (B, S, HD)
        v_g = v3[..., g * HD:(g + 1) * HD]                         # (B, S, HD)
        q_g = jnp.concatenate(
            [q3[..., (g * REP + r) * HD:(g * REP + r + 1) * HD] for r in range(REP)],
            axis=1)                                                # (B, REP*S, HD)
        s = jnp.einsum("bqd,bkd->bqk", q_g, k_g,
                       preferred_element_type=f32) + mask          # (B, REP*S, S)
        s = s - jnp.max(s, axis=-1, keepdims=True)
        p = jnp.exp(s)
        p = p * pl.reciprocal(jnp.sum(p, axis=-1, keepdims=True), approx=True)
        ctx = jnp.einsum("bqk,bkd->bqd", p.astype(bf16), v_g,
                         preferred_element_type=f32)               # (B, REP*S, HD)
        # static-offset writes into the head-ordered context scratch (no concat)
        for r in range(REP):
            h = g * REP + r
            ctx_sc[:, h * HD:(h + 1) * HD] = ctx[:, r * S:(r + 1) * S, :].reshape(B * S, HD)

    attn = jnp.dot(ctx_sc[...].astype(bf16), wo_ref[...], preferred_element_type=f32)
    h1 = x + attn                                        # residual 1

    # ---------------- feed forward ----------------
    hn = rmsnorm(h1, fnw_ref[...])
    h13 = jnp.dot(hn.astype(bf16), w13_ref[...], preferred_element_type=f32)  # (32, 512)
    gate = h13[:, :HID]
    up = h13[:, HID:]
    ff = (gate * jax.nn.sigmoid(gate)) * up              # SiLU gate in f32
    out = h1 + jnp.dot(ff.astype(bf16), w2_ref[...], preferred_element_type=f32)

    out_ref[...] = out.reshape(B, S, D)


# ------------------ one-time weight / table preparation ---------------------
def prepare_params(params, cos, sin):
    """All weight reshuffles, fusions and casts — run ONCE, outside the call path."""
    def perm_cols(w_t, nheads):
        # per-head column permutation: [even(real) half | odd(imag) half]
        d_in = w_t.shape[0]
        return (w_t.reshape(d_in, nheads, HD // 2, 2)
                   .transpose(0, 1, 3, 2)
                   .reshape(d_in, nheads * HD))

    def swap_halves(w_p, nheads):
        # per-head [re | im] -> [im | re] (rotate-half baked into weight columns)
        d_in = w_p.shape[0]
        return (w_p.reshape(d_in, nheads, 2, HD // 2)[:, :, ::-1, :]
                   .reshape(d_in, nheads * HD))

    wq_p = perm_cols(params["wq_t"], NH) * SCALE         # fold 1/sqrt(HD) into Wq
    wk_p = perm_cols(params["wk_t"], NKV)
    wq_s = swap_halves(wq_p, NH)
    wk_s = swap_halves(wk_p, NKV)
    wqkv = jnp.concatenate([wq_p, wk_p, wq_s, wk_s, params["wv_t"]],
                           axis=1).astype(jnp.bfloat16)             # (D, 448)
    wo = params["wo_t"].astype(jnp.bfloat16)
    w13 = jnp.concatenate([params["w1_t"], params["w3_t"]], axis=1).astype(jnp.bfloat16)
    w2 = params["w2_t"].astype(jnp.bfloat16)
    anw = params["attn_norm"].reshape(1, D)
    fnw = params["ffn_norm"].reshape(1, D)

    # lane-dense RoPE tables covering the fused [Q|K] slab, sign baked into sin
    cos_t = jnp.tile(jnp.concatenate([cos, cos], axis=-1), (1, NH + NKV))    # (S, 192)
    sin_t = jnp.tile(jnp.concatenate([-sin, sin], axis=-1), (1, NH + NKV))   # (S, 192)

    return dict(wqkv=wqkv, wo=wo, w13=w13, w2=w2, anw=anw, fnw=fnw,
                cos_t=cos_t, sin_t=sin_t)


# ------------------------------ pallas wrapper -------------------------------
def transformer_block_pallas(x, mask, prep):
    """x: (B, S, D) f32, mask: (S, S) f32, prep: output of prepare_params."""
    full = lambda shape: pl.BlockSpec(shape, lambda i: (0,) * len(shape))
    grid_spec = pltpu.PrefetchScalarGridSpec(
        num_scalar_prefetch=0,
        grid=(1,),                              # batch collapsed: one fat step
        in_specs=[
            full((B, S, D)),                    # x
            full((S, ROT_W)),                   # cos table
            full((S, ROT_W)),                   # sin table (signed)
            full((S, S)),                       # mask
            full((D, QKV_W)),                   # fused qkv(+swap) weight
            full((NH * HD, D)),                 # wo
            full((D, 2 * HID)),                 # fused w1|w3
            full((HID, D)),                     # w2
            full((1, D)),                       # attn norm weight
            full((1, D)),                       # ffn norm weight
        ],
        out_specs=full((B, S, D)),
        scratch_shapes=[pltpu.VMEM((B * S, NH * HD), jnp.float32)],
    )
    return pl.pallas_call(
        transformer_block_kernel,
        out_shape=jax.ShapeDtypeStruct((B, S, D), jnp.float32),
        grid_spec=grid_spec,
        compiler_params=pltpu.CompilerParams(
            dimension_semantics=("arbitrary",)),
    )(x, prep["cos_t"], prep["sin_t"], mask,
      prep["wqkv"], prep["wo"], prep["w13"], prep["w2"], prep["anw"], prep["fnw"])


# ---------------------- pure-JAX reference (for checking) -------------------
def reference_transformer_block(x, cos, sin, mask, p):
    def rmsnorm(v, w):
        ms = jnp.mean(v * v, axis=-1, keepdims=True)
        return v * jax.lax.rsqrt(ms + EPS) * w

    xn = rmsnorm(x, p["attn_norm"])
    q = (xn @ p["wq_t"]).reshape(B, S, NH, HD)
    k = (xn @ p["wk_t"]).reshape(B, S, NKV, HD)
    v = (xn @ p["wv_t"]).reshape(B, S, NKV, HD)

    def rope(t):
        tr = t.reshape(*t.shape[:-1], HD // 2, 2)
        t0, t1 = tr[..., 0], tr[..., 1]
        c = cos[None, :, None, :]
        s = sin[None, :, None, :]
        return jnp.stack([t0 * c - t1 * s, t1 * c + t0 * s], axis=-1).reshape(t.shape)

    q, k = rope(q), rope(k)
    k = jnp.repeat(k, REP, axis=2)       # repeat_interleave over kv-head dim
    v = jnp.repeat(v, REP, axis=2)
    q, k, v = (t.transpose(0, 2, 1, 3) for t in (q, k, v))   # (B, NH, S, HD)
    scores = jnp.einsum("bhqd,bhkd->bhqk", q, k) * SCALE + mask[None, None]
    probs = jax.nn.softmax(scores, axis=-1)
    o = jnp.einsum("bhqk,bhkd->bhqd", probs, v)
    o = o.transpose(0, 2, 1, 3).reshape(B, S, NH * HD)
    h = x + o @ p["wo_t"]
    hn = rmsnorm(h, p["ffn_norm"])
    return h + (jax.nn.silu(hn @ p["w1_t"]) * (hn @ p["w3_t"])) @ p["w2_t"]


# ---------------------------------- main -------------------------------------
if __name__ == "__main__":
    key = jax.random.PRNGKey(0)
    ks = jax.random.split(key, 10)

    def init_linear_t(k, fan_in, fan_out):
        # equivalent of nn.Linear(fan_in, fan_out, bias=False).weight.T
        return (jax.random.normal(k, (fan_in, fan_out), jnp.float32)
                * (fan_in ** -0.5))

    params = {
        "wq_t": init_linear_t(ks[0], D, NH * HD),
        "wk_t": init_linear_t(ks[1], D, NKV * HD),
        "wv_t": init_linear_t(ks[2], D, NKV * HD),
        "wo_t": init_linear_t(ks[3], NH * HD, D),
        "w1_t": init_linear_t(ks[4], D, HID),
        "w2_t": init_linear_t(ks[5], HID, D),
        "w3_t": init_linear_t(ks[6], D, HID),
        "attn_norm": 1.0 + 0.1 * jax.random.normal(ks[7], (D,), jnp.float32),
        "ffn_norm": 1.0 + 0.1 * jax.random.normal(ks[8], (D,), jnp.float32),
    }

    x = jax.random.normal(ks[9], (B, S, D), jnp.float32)

    # rotary embeddings (theta = 10000), as cos/sin of angle table
    inv_freq = 1.0 / (10000.0 ** (jnp.arange(0, HD, 2, dtype=jnp.float32) / HD))
    angles = jnp.outer(jnp.arange(S, dtype=jnp.float32), inv_freq)   # (S, HD//2)
    cos, sin = jnp.cos(angles), jnp.sin(angles)

    # causal mask (added to scores, like mistral reference)
    tri = jnp.tril(jnp.ones((S, S), dtype=bool))
    mask = jnp.where(tri, 0.0, -1e9).astype(jnp.float32)

    # one-time weight prep, hoisted out of the kernel call path
    prep = prepare_params(params, cos, sin)
    prep = jax.tree_util.tree_map(jax.block_until_ready, prep)

    out = transformer_block_pallas(x, mask, prep)
    out = jax.block_until_ready(out)

    ref = jax.block_until_ready(reference_transformer_block(x, cos, sin, mask, params))
    max_diff = float(jnp.max(jnp.abs(out - ref)))
    assert out.shape == (B, S, D)
    assert jnp.all(jnp.isfinite(out))
    assert jnp.allclose(out, ref, atol=5e-2, rtol=5e-2), f"max diff {max_diff}"

    print("KERNEL_OK")
</pallas_src>

<mosaic_0001>
module attributes {stable_mosaic.version = 11 : i64} {
  func.func @transformer_block_kernel(%arg0: i32, %arg1: memref<2x16x128xf32, #tpu.memory_space<vmem>>, %arg2: memref<16x192xf32, #tpu.memory_space<vmem>>, %arg3: memref<16x192xf32, #tpu.memory_space<vmem>>, %arg4: memref<16x16xf32, #tpu.memory_space<vmem>>, %arg5: memref<128x448xbf16, #tpu.memory_space<vmem>>, %arg6: memref<128x128xbf16, #tpu.memory_space<vmem>>, %arg7: memref<128x512xbf16, #tpu.memory_space<vmem>>, %arg8: memref<256x128xbf16, #tpu.memory_space<vmem>>, %arg9: memref<1x128xf32, #tpu.memory_space<vmem>>, %arg10: memref<1x128xf32, #tpu.memory_space<vmem>>, %arg11: memref<2x16x128xf32, #tpu.memory_space<vmem>>, %arg12: memref<32x128xf32, #tpu.memory_space<vmem>>) attributes {dimension_semantics = [#tpu.dimension_semantics<arbitrary>], iteration_bounds = array<i64: 1>, scalar_prefetch = 0 : i64, scratch_operands = 1 : i64, tpu.core_type = #tpu.core_type<tc>, window_params = [{pipeline_mode = #tpu.pipeline_mode<synchronous>, transform_indices = @transform_0, window_bounds = array<i64: 2, 16, 128>}, {pipeline_mode = #tpu.pipeline_mode<synchronous>, transform_indices = @transform_1, window_bounds = array<i64: 16, 192>}, {pipeline_mode = #tpu.pipeline_mode<synchronous>, transform_indices = @transform_2, window_bounds = array<i64: 16, 192>}, {pipeline_mode = #tpu.pipeline_mode<synchronous>, transform_indices = @transform_3, window_bounds = array<i64: 16, 16>}, {pipeline_mode = #tpu.pipeline_mode<synchronous>, transform_indices = @transform_4, window_bounds = array<i64: 128, 448>}, {pipeline_mode = #tpu.pipeline_mode<synchronous>, transform_indices = @transform_5, window_bounds = array<i64: 128, 128>}, {pipeline_mode = #tpu.pipeline_mode<synchronous>, transform_indices = @transform_6, window_bounds = array<i64: 128, 512>}, {pipeline_mode = #tpu.pipeline_mode<synchronous>, transform_indices = @transform_7, window_bounds = array<i64: 256, 128>}, {pipeline_mode = #tpu.pipeline_mode<synchronous>, transform_indices = @transform_8, window_bounds = array<i64: 1, 128>}, {pipeline_mode = #tpu.pipeline_mode<synchronous>, transform_indices = @transform_9, window_bounds = array<i64: 1, 128>}, {pipeline_mode = #tpu.pipeline_mode<synchronous>, transform_indices = @transform_10, window_bounds = array<i64: 2, 16, 128>}]} {
    %c0 = arith.constant 0 : index
    %c0_0 = arith.constant 0 : index
    %c0_1 = arith.constant 0 : index
    %0 = vector.load %arg1[%c0, %c0_0, %c0_1] : memref<2x16x128xf32, #tpu.memory_space<vmem>>, vector<2x16x128xf32>
    %1 = vector.shape_cast %0 : vector<2x16x128xf32> to vector<32x128xf32>
    %c0_2 = arith.constant 0 : index
    %c0_3 = arith.constant 0 : index
    %2 = vector.load %arg9[%c0_2, %c0_3] : memref<1x128xf32, #tpu.memory_space<vmem>>, vector<1x128xf32>
    %3 = arith.mulf %1, %1 : vector<32x128xf32>
    %cst = arith.constant dense<0.000000e+00> : vector<32xf32>
    %4 = vector.multi_reduction <add>, %3, %cst [1] : vector<32x128xf32> to vector<32xf32>
    %5 = vector.shape_cast %4 : vector<32xf32> to vector<32x1xf32>
    %cst_4 = arith.constant 1.280000e+02 : f32
    %6 = vector.broadcast %cst_4 : f32 to vector<32x1xf32>
    %7 = arith.divf %5, %6 : vector<32x1xf32>
    %cst_5 = arith.constant 9.99999997E-7 : f32
    %8 = vector.broadcast %cst_5 : f32 to vector<32x1xf32>
    %9 = arith.addf %7, %8 : vector<32x1xf32>
    %10 = math.rsqrt %9 : vector<32x1xf32>
    %11 = vector.broadcast %10 : vector<32x1xf32> to vector<32x128xf32>
    %12 = arith.mulf %1, %11 : vector<32x128xf32>
    %13 = vector.broadcast %2 : vector<1x128xf32> to vector<32x128xf32>
    %14 = arith.mulf %12, %13 : vector<32x128xf32>
    %15 = arith.truncf %14 : vector<32x128xf32> to vector<32x128xbf16>
    %c0_6 = arith.constant 0 : index
    %c0_7 = arith.constant 0 : index
    %16 = vector.load %arg5[%c0_6, %c0_7] : memref<128x448xbf16, #tpu.memory_space<vmem>>, vector<128x448xbf16>
    %cst_8 = arith.constant dense<0.000000e+00> : vector<32x448xf32>
    %17 = tpu.matmul %15, %16, %cst_8 {dimension_numbers = #tpu.dot_dimension_numbers<[1], [0], [0], [1], [0, 0, 1, 1], [], []>} : vector<32x128xbf16>, vector<128x448xbf16>, vector<32x448xf32> -> vector<32x448xf32>
    %18 = vector.extract_strided_slice %17 {offsets = [0, 0], sizes = [32, 192], strides = [1, 1]} : vector<32x448xf32> to vector<32x192xf32>
    %19 = vector.shape_cast %18 : vector<32x192xf32> to vector<2x16x192xf32>
    %20 = vector.extract_strided_slice %17 {offsets = [0, 192], sizes = [32, 192], strides = [1, 1]} : vector<32x448xf32> to vector<32x192xf32>
    %21 = vector.shape_cast %20 : vector<32x192xf32> to vector<2x16x192xf32>
    %c0_9 = arith.constant 0 : index
    %c0_10 = arith.constant 0 : index
    %22 = vector.load %arg2[%c0_9, %c0_10] : memref<16x192xf32, #tpu.memory_space<vmem>>, vector<16x192xf32>
    %23 = vector.shape_cast %22 : vector<16x192xf32> to vector<1x16x192xf32>
    %24 = vector.broadcast %23 : vector<1x16x192xf32> to vector<2x16x192xf32>
    %25 = arith.mulf %19, %24 : vector<2x16x192xf32>
    %c0_11 = arith.constant 0 : index
    %c0_12 = arith.constant 0 : index
    %26 = vector.load %arg3[%c0_11, %c0_12] : memref<16x192xf32, #tpu.memory_space<vmem>>, vector<16x192xf32>
    %27 = vector.shape_cast %26 : vector<16x192xf32> to vector<1x16x192xf32>
    %28 = vector.broadcast %27 : vector<1x16x192xf32> to vector<2x16x192xf32>
    %29 = arith.mulf %21, %28 : vector<2x16x192xf32>
    %30 = arith.addf %25, %29 : vector<2x16x192xf32>
    %31 = arith.truncf %30 : vector<2x16x192xf32> to vector<2x16x192xbf16>
    %32 = vector.extract_strided_slice %31 {offsets = [0, 0, 0], sizes = [2, 16, 128], strides = [1, 1, 1]} : vector<2x16x192xbf16> to vector<2x16x128xbf16>
    %33 = vector.extract_strided_slice %31 {offsets = [0, 0, 128], sizes = [2, 16, 64], strides = [1, 1, 1]} : vector<2x16x192xbf16> to vector<2x16x64xbf16>
    %34 = vector.extract_strided_slice %17 {offsets = [0, 384], sizes = [32, 64], strides = [1, 1]} : vector<32x448xf32> to vector<32x64xf32>
    %35 = vector.shape_cast %34 : vector<32x64xf32> to vector<2x16x64xf32>
    %36 = arith.truncf %35 : vector<2x16x64xf32> to vector<2x16x64xbf16>
    %c0_13 = arith.constant 0 : index
    %c0_14 = arith.constant 0 : index
    %37 = vector.load %arg4[%c0_13, %c0_14] : memref<16x16xf32, #tpu.memory_space<vmem>>, vector<16x16xf32>
    %38 = tpu.concatenate %37, %37 in 0 : vector<16x16xf32>, vector<16x16xf32> -> vector<32x16xf32>
    %39 = vector.shape_cast %38 : vector<32x16xf32> to vector<1x32x16xf32>
    %40 = vector.extract_strided_slice %33 {offsets = [0, 0, 0], sizes = [2, 16, 32], strides = [1, 1, 1]} : vector<2x16x64xbf16> to vector<2x16x32xbf16>
    %41 = vector.extract_strided_slice %36 {offsets = [0, 0, 0], sizes = [2, 16, 32], strides = [1, 1, 1]} : vector<2x16x64xbf16> to vector<2x16x32xbf16>
    %42 = vector.extract_strided_slice %32 {offsets = [0, 0, 0], sizes = [2, 16, 32], strides = [1, 1, 1]} : vector<2x16x128xbf16> to vector<2x16x32xbf16>
    %43 = vector.extract_strided_slice %32 {offsets = [0, 0, 32], sizes = [2, 16, 32], strides = [1, 1, 1]} : vector<2x16x128xbf16> to vector<2x16x32xbf16>
    %44 = tpu.concatenate %42, %43 in 1 : vector<2x16x32xbf16>, vector<2x16x32xbf16> -> vector<2x32x32xbf16>
    "tpu.trace_start"() <{level = 10 : i32, message = "bqd,bkd->bqk"}> : () -> ()
    %cst_15 = arith.constant dense<0.000000e+00> : vector<2x32x16xf32>
    %45 = tpu.matmul %44, %40, %cst_15 {dimension_numbers = #tpu.dot_dimension_numbers<[2], [2], [1], [1], [0, 0, 0, 1, 1, 1], [0], [0]>} : vector<2x32x32xbf16>, vector<2x16x32xbf16>, vector<2x32x16xf32> -> vector<2x32x16xf32>
    "tpu.trace_stop"() : () -> ()
    %46 = vector.broadcast %39 : vector<1x32x16xf32> to vector<2x32x16xf32>
    %47 = arith.addf %45, %46 : vector<2x32x16xf32>
    %cst_16 = arith.constant dense<0xFF800000> : vector<2x32xf32>
    %48 = vector.multi_reduction <maximumf>, %47, %cst_16 [2] : vector<2x32x16xf32> to vector<2x32xf32>
    %49 = vector.shape_cast %48 : vector<2x32xf32> to vector<2x32x1xf32>
    %50 = vector.broadcast %49 : vector<2x32x1xf32> to vector<2x32x16xf32>
    %51 = arith.subf %47, %50 : vector<2x32x16xf32>
    %52 = math.exp %51 : vector<2x32x16xf32>
    %cst_17 = arith.constant dense<0.000000e+00> : vector<2x32xf32>
    %53 = vector.multi_reduction <add>, %52, %cst_17 [2] : vector<2x32x16xf32> to vector<2x32xf32>
    %54 = vector.shape_cast %53 : vector<2x32xf32> to vector<2x32x1xf32>
    %55 = tpu.reciprocal %54 {approx = true} : vector<2x32x1xf32> -> vector<2x32x1xf32>
    %56 = vector.broadcast %55 : vector<2x32x1xf32> to vector<2x32x16xf32>
    %57 = arith.mulf %52, %56 : vector<2x32x16xf32>
    %58 = arith.truncf %57 : vector<2x32x16xf32> to vector<2x32x16xbf16>
    "tpu.trace_start"() <{level = 10 : i32, message = "bqk,bkd->bqd"}> : () -> ()
    %cst_18 = arith.constant dense<0.000000e+00> : vector<2x32x32xf32>
    %59 = tpu.matmul %58, %41, %cst_18 {dimension_numbers = #tpu.dot_dimension_numbers<[2], [1], [1], [2], [0, 0, 0, 1, 1, 2], [0], [0]>} : vector<2x32x16xbf16>, vector<2x16x32xbf16>, vector<2x32x32xf32> -> vector<2x32x32xf32>
    "tpu.trace_stop"() : () -> ()
    %60 = vector.extract_strided_slice %59 {offsets = [0, 0, 0], sizes = [2, 16, 32], strides = [1, 1, 1]} : vector<2x32x32xf32> to vector<2x16x32xf32>
    %61 = vector.shape_cast %60 : vector<2x16x32xf32> to vector<32x32xf32>
    %c0_19 = arith.constant 0 : index
    %c0_20 = arith.constant 0 : index
    %62 = vector.load %arg12[%c0_19, %c0_20] : memref<32x128xf32, #tpu.memory_space<vmem>>, vector<32x32xf32>
    tpu.vector_store %arg12[%c0_19, %c0_20], %61 {strides = array<i32>} : memref<32x128xf32, #tpu.memory_space<vmem>>, vector<32x32xf32>,
    %63 = vector.extract_strided_slice %59 {offsets = [0, 16, 0], sizes = [2, 16, 32], strides = [1, 1, 1]} : vector<2x32x32xf32> to vector<2x16x32xf32>
    %64 = vector.shape_cast %63 : vector<2x16x32xf32> to vector<32x32xf32>
    %c0_21 = arith.constant 0 : index
    %c32 = arith.constant 32 : index
    %65 = vector.load %arg12[%c0_21, %c32] : memref<32x128xf32, #tpu.memory_space<vmem>>, vector<32x32xf32>
    tpu.vector_store %arg12[%c0_21, %c32], %64 {strides = array<i32>} : memref<32x128xf32, #tpu.memory_space<vmem>>, vector<32x32xf32>,
    %66 = vector.extract_strided_slice %33 {offsets = [0, 0, 32], sizes = [2, 16, 32], strides = [1, 1, 1]} : vector<2x16x64xbf16> to vector<2x16x32xbf16>
    %67 = vector.extract_strided_slice %36 {offsets = [0, 0, 32], sizes = [2, 16, 32], strides = [1, 1, 1]} : vector<2x16x64xbf16> to vector<2x16x32xbf16>
    %68 = vector.extract_strided_slice %32 {offsets = [0, 0, 64], sizes = [2, 16, 32], strides = [1, 1, 1]} : vector<2x16x128xbf16> to vector<2x16x32xbf16>
    %69 = vector.extract_strided_slice %32 {offsets = [0, 0, 96], sizes = [2, 16, 32], strides = [1, 1, 1]} : vector<2x16x128xbf16> to vector<2x16x32xbf16>
    %70 = tpu.concatenate %68, %69 in 1 : vector<2x16x32xbf16>, vector<2x16x32xbf16> -> vector<2x32x32xbf16>
    "tpu.trace_start"() <{level = 10 : i32, message = "bqd,bkd->bqk"}> : () -> ()
    %cst_22 = arith.constant dense<0.000000e+00> : vector<2x32x16xf32>
    %71 = tpu.matmul %70, %66, %cst_22 {dimension_numbers = #tpu.dot_dimension_numbers<[2], [2], [1], [1], [0, 0, 0, 1, 1, 1], [0], [0]>} : vector<2x32x32xbf16>, vector<2x16x32xbf16>, vector<2x32x16xf32> -> vector<2x32x16xf32>
    "tpu.trace_stop"() : () -> ()
    %72 = vector.broadcast %39 : vector<1x32x16xf32> to vector<2x32x16xf32>
    %73 = arith.addf %71, %72 : vector<2x32x16xf32>
    %cst_23 = arith.constant dense<0xFF800000> : vector<2x32xf32>
    %74 = vector.multi_reduction <maximumf>, %73, %cst_23 [2] : vector<2x32x16xf32> to vector<2x32xf32>
    %75 = vector.shape_cast %74 : vector<2x32xf32> to vector<2x32x1xf32>
    %76 = vector.broadcast %75 : vector<2x32x1xf32> to vector<2x32x16xf32>
    %77 = arith.subf %73, %76 : vector<2x32x16xf32>
    %78 = math.exp %77 : vector<2x32x16xf32>
    %cst_24 = arith.constant dense<0.000000e+00> : vector<2x32xf32>
    %79 = vector.multi_reduction <add>, %78, %cst_24 [2] : vector<2x32x16xf32> to vector<2x32xf32>
    %80 = vector.shape_cast %79 : vector<2x32xf32> to vector<2x32x1xf32>
    %81 = tpu.reciprocal %80 {approx = true} : vector<2x32x1xf32> -> vector<2x32x1xf32>
    %82 = vector.broadcast %81 : vector<2x32x1xf32> to vector<2x32x16xf32>
    %83 = arith.mulf %78, %82 : vector<2x32x16xf32>
    %84 = arith.truncf %83 : vector<2x32x16xf32> to vector<2x32x16xbf16>
    "tpu.trace_start"() <{level = 10 : i32, message = "bqk,bkd->bqd"}> : () -> ()
    %cst_25 = arith.constant dense<0.000000e+00> : vector<2x32x32xf32>
    %85 = tpu.matmul %84, %67, %cst_25 {dimension_numbers = #tpu.dot_dimension_numbers<[2], [1], [1], [2], [0, 0, 0, 1, 1, 2], [0], [0]>} : vector<2x32x16xbf16>, vector<2x16x32xbf16>, vector<2x32x32xf32> -> vector<2x32x32xf32>
    "tpu.trace_stop"() : () -> ()
    %86 = vector.extract_strided_slice %85 {offsets = [0, 0, 0], sizes = [2, 16, 32], strides = [1, 1, 1]} : vector<2x32x32xf32> to vector<2x16x32xf32>
    %87 = vector.shape_cast %86 : vector<2x16x32xf32> to vector<32x32xf32>
    %c0_26 = arith.constant 0 : index
    %c64 = arith.constant 64 : index
    %88 = vector.load %arg12[%c0_26, %c64] : memref<32x128xf32, #tpu.memory_space<vmem>>, vector<32x32xf32>
    tpu.vector_store %arg12[%c0_26, %c64], %87 {strides = array<i32>} : memref<32x128xf32, #tpu.memory_space<vmem>>, vector<32x32xf32>,
    %89 = vector.extract_strided_slice %85 {offsets = [0, 16, 0], sizes = [2, 16, 32], strides = [1, 1, 1]} : vector<2x32x32xf32> to vector<2x16x32xf32>
    %90 = vector.shape_cast %89 : vector<2x16x32xf32> to vector<32x32xf32>
    %c0_27 = arith.constant 0 : index
    %c96 = arith.constant 96 : index
    %91 = vector.load %arg12[%c0_27, %c96] : memref<32x128xf32, #tpu.memory_space<vmem>>, vector<32x32xf32>
    tpu.vector_store %arg12[%c0_27, %c96], %90 {strides = array<i32>} : memref<32x128xf32, #tpu.memory_space<vmem>>, vector<32x32xf32>,
    %c0_28 = arith.constant 0 : index
    %c0_29 = arith.constant 0 : index
    %92 = vector.load %arg12[%c0_28, %c0_29] : memref<32x128xf32, #tpu.memory_space<vmem>>, vector<32x128xf32>
    %93 = arith.truncf %92 : vector<32x128xf32> to vector<32x128xbf16>
    %c0_30 = arith.constant 0 : index
    %c0_31 = arith.constant 0 : index
    %94 = vector.load %arg6[%c0_30, %c0_31] : memref<128x128xbf16, #tpu.memory_space<vmem>>, vector<128x128xbf16>
    %cst_32 = arith.constant dense<0.000000e+00> : vector<32x128xf32>
    %95 = tpu.matmul %93, %94, %cst_32 {dimension_numbers = #tpu.dot_dimension_numbers<[1], [0], [0], [1], [0, 0, 1, 1], [], []>} : vector<32x128xbf16>, vector<128x128xbf16>, vector<32x128xf32> -> vector<32x128xf32>
    %96 = arith.addf %1, %95 : vector<32x128xf32>
    %c0_33 = arith.constant 0 : index
    %c0_34 = arith.constant 0 : index
    %97 = vector.load %arg10[%c0_33, %c0_34] : memref<1x128xf32, #tpu.memory_space<vmem>>, vector<1x128xf32>
    %98 = arith.mulf %96, %96 : vector<32x128xf32>
    %cst_35 = arith.constant dense<0.000000e+00> : vector<32xf32>
    %99 = vector.multi_reduction <add>, %98, %cst_35 [1] : vector<32x128xf32> to vector<32xf32>
    %100 = vector.shape_cast %99 : vector<32xf32> to vector<32x1xf32>
    %cst_36 = arith.constant 1.280000e+02 : f32
    %101 = vector.broadcast %cst_36 : f32 to vector<32x1xf32>
    %102 = arith.divf %100, %101 : vector<32x1xf32>
    %cst_37 = arith.constant 9.99999997E-7 : f32
    %103 = vector.broadcast %cst_37 : f32 to vector<32x1xf32>
    %104 = arith.addf %102, %103 : vector<32x1xf32>
    %105 = math.rsqrt %104 : vector<32x1xf32>
    %106 = vector.broadcast %105 : vector<32x1xf32> to vector<32x128xf32>
    %107 = arith.mulf %96, %106 : vector<32x128xf32>
    %108 = vector.broadcast %97 : vector<1x128xf32> to vector<32x128xf32>
    %109 = arith.mulf %107, %108 : vector<32x128xf32>
    %110 = arith.truncf %109 : vector<32x128xf32> to vector<32x128xbf16>
    %c0_38 = arith.constant 0 : index
    %c0_39 = arith.constant 0 : index
    %111 = vector.load %arg7[%c0_38, %c0_39] : memref<128x512xbf16, #tpu.memory_space<vmem>>, vector<128x512xbf16>
    %cst_40 = arith.constant dense<0.000000e+00> : vector<32x512xf32>
    %112 = tpu.matmul %110, %111, %cst_40 {dimension_numbers = #tpu.dot_dimension_numbers<[1], [0], [0], [1], [0, 0, 1, 1], [], []>} : vector<32x128xbf16>, vector<128x512xbf16>, vector<32x512xf32> -> vector<32x512xf32>
    %113 = vector.extract_strided_slice %112 {offsets = [0, 0], sizes = [32, 256], strides = [1, 1]} : vector<32x512xf32> to vector<32x256xf32>
    %114 = vector.extract_strided_slice %112 {offsets = [0, 256], sizes = [32, 256], strides = [1, 1]} : vector<32x512xf32> to vector<32x256xf32>
    %115 = arith.negf %113 : vector<32x256xf32>
    %116 = math.exp %115 : vector<32x256xf32>
    %cst_41 = arith.constant 1.000000e+00 : f32
    %117 = vector.broadcast %cst_41 : f32 to vector<32x256xf32>
    %118 = arith.addf %117, %116 : vector<32x256xf32>
    %119 = arith.divf %117, %118 : vector<32x256xf32>
    %120 = arith.mulf %113, %119 : vector<32x256xf32>
    %121 = arith.mulf %120, %114 : vector<32x256xf32>
    %122 = arith.truncf %121 : vector<32x256xf32> to vector<32x256xbf16>
    %c0_42 = arith.constant 0 : index
    %c0_43 = arith.constant 0 : index
    %123 = vector.load %arg8[%c0_42, %c0_43] : memref<256x128xbf16, #tpu.memory_space<vmem>>, vector<256x128xbf16>
    %cst_44 = arith.constant dense<0.000000e+00> : vector<32x128xf32>
    %124 = tpu.matmul %122, %123, %cst_44 {dimension_numbers = #tpu.dot_dimension_numbers<[1], [0], [0], [1], [0, 0, 1, 1], [], []>} : vector<32x256xbf16>, vector<256x128xbf16>, vector<32x128xf32> -> vector<32x128xf32>
    %125 = arith.addf %96, %124 : vector<32x128xf32>
    %126 = vector.shape_cast %125 : vector<32x128xf32> to vector<2x16x128xf32>
    %c0_45 = arith.constant 0 : index
    %c0_46 = arith.constant 0 : index
    %c0_47 = arith.constant 0 : index
    %127 = vector.load %arg11[%c0_45, %c0_46, %c0_47] : memref<2x16x128xf32, #tpu.memory_space<vmem>>, vector<2x16x128xf32>
    tpu.vector_store %arg11[%c0_45, %c0_46, %c0_47], %126 {strides = array<i32>} : memref<2x16x128xf32, #tpu.memory_space<vmem>>, vector<2x16x128xf32>,
    return
  }
  func.func @transform_0(%arg0: i32) -> (i32, i32, i32) {
    %c0_i32 = arith.constant 0 : i32
    %c0_i32_0 = arith.constant 0 : i32
    %c0_i32_1 = arith.constant 0 : i32
    %c0_i32_2 = arith.constant 0 : i32
    return %c0_i32, %c0_i32_0, %c0_i32_1 : i32, i32, i32
  }
  func.func @transform_1(%arg0: i32) -> (i32, i32) {
    %c0_i32 = arith.constant 0 : i32
    %c0_i32_0 = arith.constant 0 : i32
    %c0_i32_1 = arith.constant 0 : i32
    return %c0_i32, %c0_i32_0 : i32, i32
  }
  func.func @transform_2(%arg0: i32) -> (i32, i32) {
    %c0_i32 = arith.constant 0 : i32
    %c0_i32_0 = arith.constant 0 : i32
    %c0_i32_1 = arith.constant 0 : i32
    return %c0_i32, %c0_i32_0 : i32, i32
  }
  func.func @transform_3(%arg0: i32) -> (i32, i32) {
    %c0_i32 = arith.constant 0 : i32
    %c0_i32_0 = arith.constant 0 : i32
    %c0_i32_1 = arith.constant 0 : i32
    return %c0_i32, %c0_i32_0 : i32, i32
  }
  func.func @transform_4(%arg0: i32) -> (i32, i32) {
    %c0_i32 = arith.constant 0 : i32
    %c0_i32_0 = arith.constant 0 : i32
    %c0_i32_1 = arith.constant 0 : i32
    return %c0_i32, %c0_i32_0 : i32, i32
  }
  func.func @transform_5(%arg0: i32) -> (i32, i32) {
    %c0_i32 = arith.constant 0 : i32
    %c0_i32_0 = arith.constant 0 : i32
    %c0_i32_1 = arith.constant 0 : i32
    return %c0_i32, %c0_i32_0 : i32, i32
  }
  func.func @transform_6(%arg0: i32) -> (i32, i32) {
    %c0_i32 = arith.constant 0 : i32
    %c0_i32_0 = arith.constant 0 : i32
    %c0_i32_1 = arith.constant 0 : i32
    return %c0_i32, %c0_i32_0 : i32, i32
  }
  func.func @transform_7(%arg0: i32) -> (i32, i32) {
    %c0_i32 = arith.constant 0 : i32
    %c0_i32_0 = arith.constant 0 : i32
    %c0_i32_1 = arith.constant 0 : i32
    return %c0_i32, %c0_i32_0 : i32, i32
  }
  func.func @transform_8(%arg0: i32) -> (i32, i32) {
    %c0_i32 = arith.constant 0 : i32
    %c0_i32_0 = arith.constant 0 : i32
    %c0_i32_1 = arith.constant 0 : i32
    return %c0_i32, %c0_i32_0 : i32, i32
  }
  func.func @transform_9(%arg0: i32) -> (i32, i32) {
    %c0_i32 = arith.constant 0 : i32
    %c0_i32_0 = arith.constant 0 : i32
    %c0_i32_1 = arith.constant 0 : i32
    return %c0_i32, %c0_i32_0 : i32, i32
  }
  func.func @transform_10(%arg0: i32) -> (i32, i32, i32) {
    %c0_i32 = arith.constant 0 : i32
    %c0_i32_0 = arith.constant 0 : i32
    %c0_i32_1 = arith.constant 0 : i32
    %c0_i32_2 = arith.constant 0 : i32
    return %c0_i32, %c0_i32_0, %c0_i32_1 : i32, i32, i32
  }
}

</mosaic_0001>

<bundles_post_ra>
// kernel: tpu_custom_call.1
= control target key start
LH: loop header
LB: loop body
LE: loop exit
PB: predicated region body
PF: predicated region fallthrough
CT: control target
= control target key end

     0   :  { %15 = vsyncpa [#allocation4], 0  ;;  %s3206_s0 = inlined_call_operand.vmem [shape: f32[2,16,128], index: 0, kind: input, shape index: {}]   ;;  %s3207_s1 = inlined_call_operand.hbm [shape: f32[16,192], index: 1, kind: input, shape index: {}]   ;;  %s3208_s2 = inlined_call_operand.hbm [shape: f32[16,192], index: 2, kind: input, shape index: {}]   ;;  %s3209_s3 = inlined_call_operand.hbm [shape: f32[16,16], index: 3, kind: input, shape index: {}]   ;;  %s3210_s4 = inlined_call_operand.vmem [shape: bf16[128,448], index: 4, kind: input, shape index: {}]   ;;  %s3211_s5 = inlined_call_operand.vmem [shape: bf16[128,128], index: 5, kind: input, shape index: {}]   ;;  %s3212_s6 = inlined_call_operand.vmem [shape: bf16[128,512], index: 6, kind: input, shape index: {}]   ;;  %s3213_s7 = inlined_call_operand.vmem [shape: bf16[256,128], index: 7, kind: input, shape index: {}]   ;;  %s3214_s8 = inlined_call_operand.vmem [shape: f32[1,128], index: 8, kind: input, shape index: {}]   ;;  %s3215_s9 = inlined_call_operand.vmem [shape: f32[1,128], index: 9, kind: input, shape index: {}]   ;;  %s3216_s10 = inlined_call_operand.hbm [shape: f32[2,16,128], index: 10, kind: output, shape index: {}]  }
   0x1   :  { %16 = vsyncpa [#allocation7], 0 }
   0x2   :  { %17 = vsyncpa [#allocation5], 0  ;;  %s2565_s13 = smov [#allocation6]   ;;  %s2566_s15 = smov [#allocation3]  }
   0x3   :  { %s37_s14 = sshll.u32 %s2565_s13, 4  ;;  %s25_s16 = sshll.u32 %s2566_s15, 4  ;;  %s38_s14 = int_to_ptr.vmem [resolvable:$true] %s37_s14  ;;  %s26_s16 = int_to_ptr.vmem [resolvable:$true] %s25_s16 }
   0x4   :  { %s2487_s17 = scalar_lea.vmem %s38_s14, 512  ;;  %p2492_p1 = scmp.lt.s32.totalorder %s38_s14, %s38_s14 }
   0x5   :  { %p2488_p0 = scmp.ne.s32.totalorder %s38_s14, %s2487_s17  ;;  %p2493_p2 = scmp.lt.s32.totalorder %s2487_s17, %s2487_s17 }
   0x7   :  { %p2494_p3 = por %p2493_p2, %p2492_p1 }
   0x9   :  { %p2495_p4 = pnand %p2494_p3, %p2488_p0 }
   0xb   :  { %2498 = shalt.err (!%p2495_p4)
}
   0xc   :  { %s2567_s18 = smov 256   ;;  %s2568_s19 = smov 16  }
   0xd   :  { %43 = dma.hbm_to_vmem [thread:$0]  %s3208_s2, 512, %s38_s14, [#allocation7], %s2567_s18, %s2567_s18, %s2568_s19  }
   0xe   :  { %s2507_s22 = scalar_lea.vmem %s26_s16, 512  ;;  %p2512_p6 = scmp.lt.s32.totalorder %s26_s16, %s26_s16 }
   0xf   :  { %p2508_p5 = scmp.ne.s32.totalorder %s26_s16, %s2507_s22  ;;  %p2513_p7 = scmp.lt.s32.totalorder %s2507_s22, %s2507_s22 }
  0x11   :  { %p2514_p8 = por %p2513_p7, %p2512_p6 }
  0x13   :  { %p2515_p9 = pnand %p2514_p8, %p2508_p5 }
  0x15   :  { %2518 = shalt.err (!%p2515_p9)
}
  0x16   :  { %31 = dma.hbm_to_vmem [thread:$0]  %s3207_s1, 512, %s26_s16, [#allocation4], %s2567_s18, %s2567_s18, %s2568_s19  }
  0x17   :  { %s2569_s25 = smov [#allocation8]  }
  0x18   :  { %s49_s26 = sshll.u32 %s2569_s25, 4  ;;  %s50_s26 = int_to_ptr.vmem [resolvable:$true] %s49_s26 }
  0x19   :  { %s2527_s27 = scalar_lea.vmem %s50_s26, 256  ;;  %p2532_p11 = scmp.lt.s32.totalorder %s50_s26, %s50_s26 }
  0x1a   :  { %p2528_p10 = scmp.ne.s32.totalorder %s50_s26, %s2527_s27  ;;  %p2533_p12 = scmp.lt.s32.totalorder %s2527_s27, %s2527_s27 }
  0x1c   :  { %p2534_p13 = por %p2533_p12, %p2532_p11 }
  0x1e   :  { %p2535_p0 = pnand %p2534_p13, %p2528_p10 }
  0x20   :  { %2538 = shalt.err (!%p2535_p0)
}
  0x21   :  { %s2570_s2 = smov 128   ;;  %s2571_s28 = smov 8  }
  0x22   :  { %55 = dma.hbm_to_vmem [thread:$0]  %s3209_s3, 256, %s50_s26, [#allocation7], %s2570_s2, %s2570_s2, %s2571_s28  }
  0x23   :  { %2559 = dma.done.wait [#allocation4], 512  }
  0x24   :  { %2560 = vsyncadd [#allocation4], 4294966784 }
  0x25   :  { %2561 = dma.done.wait [#allocation7], 768  }
  0x26   :  { %2562 = vsyncadd [#allocation7], 4294966528  ;;  %v2647_v0 = vld [vmem:[%s3206_s0] sm:$0xff]  ;;  %v2652_v1 = vld [vmem:[%s3206_s0 + $0x8] sm:$0xff]  ;;  %v2572_v36 = vmov 0   ;;  %s2573_s18 = smov 64  }
  0x27   :  { %v2657_v2 = vld [vmem:[%s3206_s0 + $0x10] sm:$0xff]  ;;  %v83_v3 = vmul.f32 %v2647_v0, %v2647_v0  ;;  %v2666_v5 = vld [vmem:[%s3206_s0 + $0x18] sm:$0xff]  ;;  %v84_v7 = vmul.f32 %v2652_v1, %v2652_v1  ;;  %348 = vmatprep.mubr.bf16.mxu0 %v2572_v36  ;;  %401 = vmatprep.mubr.bf16.mxu1 %v2572_v36  ;;  %v435_v41 = vld [vmem:[#allocation6 + $0x8] sm:$0xff]  ;;  %vm450_vm0 = vcmask 523264   ;;  %vm523_vm1 = vcmask 261120   ;;  %s2575_s20 = smov 32  }
  0x28   :  { %v85_v4 = vmul.f32 %v2657_v2, %v2657_v2  ;;  %v2243_v6 = vld [vmem:[%s3210_s4 + $0xe4] ss:$16 sps:$4 sm:$0xff]   ;;  %v86_v8 = vmul.f32 %v2666_v5, %v2666_v5  ;;  %v2245_v9 = vld [vmem:[%s3210_s4 + $0xec] ss:$16 sps:$4 sm:$0xff]   ;;  %v2247_v10 = vld [vmem:[%s3210_s4 + $0xe0] ss:$16 sps:$4 sm:$0xff]  }
  0x29   :  { %87 = vadd.xlane.f32.xlu0 %v83_v3  ;;  %v2248_v11 = vld [vmem:[%s3210_s4 + $0xe8] ss:$16 sps:$4 sm:$0xff]   ;;  %316 = vmatprep.subr.bf16.mxu0 %v2243_v6  ;;  %v2249_v12 = vld [vmem:[%s3210_s4 + $0xc4] ss:$16 sps:$4 sm:$0xff]   ;;  %v2251_v13 = vld [vmem:[%s3210_s4 + $0xcc] ss:$16 sps:$4 sm:$0xff]  }
  0x2a   :  { %91 = vadd.xlane.f32.xlu1 %v85_v4  ;;  %369 = vmatprep.subr.bf16.mxu1 %v2245_v9  ;;  %v2253_v14 = vld [vmem:[%s3210_s4 + $0xc0] ss:$16 sps:$4 sm:$0xff]   ;;  %v2254_v15 = vld [vmem:[%s3210_s4 + $0xc8] ss:$16 sps:$4 sm:$0xff]   ;;  %v2255_v16 = vld [vmem:[%s3210_s4 + $0xa4] ss:$16 sps:$4 sm:$0xff]  }
  0x2b   :  { %317 = vmatpush1.bf16.msra.mxu0 %v2247_v10  ;;  %370 = vmatpush1.bf16.msra.mxu1 %v2248_v11  ;;  %v2257_v17 = vld [vmem:[%s3210_s4 + $0xac] ss:$16 sps:$4 sm:$0xff]   ;;  %v2259_v18 = vld [vmem:[%s3210_s4 + $0xa0] ss:$16 sps:$4 sm:$0xff]   ;;  %v2260_v19 = vld [vmem:[%s3210_s4 + $0xa8] ss:$16 sps:$4 sm:$0xff]  }
  0x2c   :  { %318 = vmatprep.subr.bf16.mxu0 %v2249_v12  ;;  %371 = vmatprep.subr.bf16.mxu1 %v2251_v13  ;;  %v2261_v20 = vld [vmem:[%s3210_s4 + $0x84] ss:$16 sps:$4 sm:$0xff]   ;;  %v2263_v21 = vld [vmem:[%s3210_s4 + $0x8c] ss:$16 sps:$4 sm:$0xff]   ;;  %v2265_v22 = vld [vmem:[%s3210_s4 + $0x80] ss:$16 sps:$4 sm:$0xff]  }
  0x2d   :  { %89 = vadd.xlane.f32.xlu0 %v84_v7  ;;  %v2266_v23 = vld [vmem:[%s3210_s4 + $0x88] ss:$16 sps:$4 sm:$0xff]   ;;  %v2267_v24 = vld [vmem:[%s3210_s4 + $0x64] ss:$16 sps:$4 sm:$0xff]   ;;  %v2269_v25 = vld [vmem:[%s3210_s4 + $0x6c] ss:$16 sps:$4 sm:$0xff]  }
  0x2e   :  { %93 = vadd.xlane.f32.xlu1 %v86_v8  ;;  %v2271_v26 = vld [vmem:[%s3210_s4 + $0x60] ss:$16 sps:$4 sm:$0xff]   ;;  %v2272_v27 = vld [vmem:[%s3210_s4 + $0x68] ss:$16 sps:$4 sm:$0xff]   ;;  %v2273_v28 = vld [vmem:[%s3210_s4 + $0x44] ss:$16 sps:$4 sm:$0xff]  }
  0x2f   :  { %319 = vmatpush1.bf16.msra.mxu0 %v2253_v14  ;;  %372 = vmatpush1.bf16.msra.mxu1 %v2254_v15  ;;  %v2275_v29 = vld [vmem:[%s3210_s4 + $0x4c] ss:$16 sps:$4 sm:$0xff]   ;;  %v2277_v30 = vld [vmem:[%s3210_s4 + $0x40] ss:$16 sps:$4 sm:$0xff]   ;;  %v2278_v31 = vld [vmem:[%s3210_s4 + $0x48] ss:$16 sps:$4 sm:$0xff]  }
  0x30   :  { %320 = vmatprep.subr.bf16.mxu0 %v2255_v16  ;;  %373 = vmatprep.subr.bf16.mxu1 %v2257_v17  ;;  %v2279_v32 = vld [vmem:[%s3210_s4 + $0x24] ss:$16 sps:$4 sm:$0xff]   ;;  %v2281_v33 = vld [vmem:[%s3210_s4 + $0x2c] ss:$16 sps:$4 sm:$0xff]   ;;  %v2283_v34 = vld [vmem:[%s3210_s4 + $0x20] ss:$16 sps:$4 sm:$0xff]  }
  0x31   :  { %v2284_v35 = vld [vmem:[%s3210_s4 + $0x28] ss:$16 sps:$4 sm:$0xff]   ;;  %v2285_v37 = vld [vmem:[%s3210_s4 + $0x4] ss:$16 sps:$4 sm:$0xff]   ;;  %v2287_v38 = vld [vmem:[%s3210_s4 + $0xc] ss:$16 sps:$4 sm:$0xff]  }
  0x32   :  { %v2289_v39 = vld [vmem:[%s3210_s4] ss:$16 sps:$4 sm:$0xff]   ;;  %v2290_v40 = vld [vmem:[%s3210_s4 + $0x8] ss:$16 sps:$4 sm:$0xff]   ;;  %vm640_vm2 = vcmask 130048   ;;  %vm863_vm3 = vcmask 523520  }
  0x33   :  { %321 = vmatpush1.bf16.msra.mxu0 %v2259_v18  ;;  %374 = vmatpush1.bf16.msra.mxu1 %v2260_v19  ;;  %v434_v42 = vld [vmem:[#allocation6] sm:$0xff]  ;;  %v436_v43 = vld [vmem:[#allocation6 + $0x10] sm:$0xff]  ;;  %v437_v44 = vld [vmem:[#allocation6 + $0x18] sm:$0xff]  ;;  %vm1224_vm4 = vcmask 785920   ;;  %vm1245_vm5 = vcmask 1048320  }
  0x34   :  { %322 = vmatprep.subr.bf16.mxu0 %v2261_v20  ;;  %375 = vmatprep.subr.bf16.mxu1 %v2263_v21  ;;  %v1983_v61 = vld [vmem:[%s3214_s8] ss:$0 sm:$0xff]  ;;  %s2574_s8 = smov 96  }
  0x37   :  { %323 = vmatpush1.bf16.msra.mxu0 %v2265_v22  ;;  %376 = vmatpush1.bf16.msra.mxu1 %v2266_v23 }
  0x38   :  { %324 = vmatprep.subr.bf16.mxu0 %v2267_v24  ;;  %377 = vmatprep.subr.bf16.mxu1 %v2269_v25 }
  0x3b   :  { %325 = vmatpush1.bf16.msra.mxu0 %v2271_v26  ;;  %378 = vmatpush1.bf16.msra.mxu1 %v2272_v27 }
  0x3c   :  { %326 = vmatprep.subr.bf16.mxu0 %v2273_v28  ;;  %379 = vmatprep.subr.bf16.mxu1 %v2275_v29 }
  0x3f   :  { %327 = vmatpush1.bf16.msra.mxu0 %v2277_v30  ;;  %380 = vmatpush1.bf16.msra.mxu1 %v2278_v31 }
  0x40   :  { %328 = vmatprep.subr.bf16.mxu0 %v2279_v32  ;;  %381 = vmatprep.subr.bf16.mxu1 %v2281_v33 }
  0x41   :  { %444 = vrot.lane.b32.xlu1 %v435_v41, %s2573_s18 }
  0x43   :  { %329 = vmatpush1.bf16.msra.mxu0 %v2283_v34  ;;  %382 = vmatpush1.bf16.msra.mxu1 %v2284_v35 }
  0x44   :  { %330 = vmatprep.subr.bf16.mxu0 %v2285_v37  ;;  %383 = vmatprep.subr.bf16.mxu1 %v2287_v38 }
  0x45   :  { %442 = vrot.lane.b32.xlu0 %v434_v42, %s2573_s18  ;;  %446 = vrot.lane.b32.xlu1 %v436_v43, %s2573_s18  ;;  %v422_v43 = vld [vmem:[#allocation3] sm:$0xff] }
  0x47   :  { %331 = vmatpush1.bf16.msra.mxu0 %v2289_v39  ;;  %384 = vmatpush1.bf16.msra.mxu1 %v2290_v40  ;;  %v423_v39 = vld [vmem:[#allocation3 + $0x8] sm:$0xff]  ;;  %v425_v40 = vld [vmem:[#allocation3 + $0x18] sm:$0xff] }
  0x49   :  { %448 = vrot.lane.b32.xlu1 %v437_v44, %s2573_s18 }
  0xb2   :  { %v88_v45 = vpop.xlane.xlu0 %87 }
  0xb3   :  { %v92_v46 = vpop.xlane.xlu1 %91  ;;  %v96_v47 = vmul.f32 0.0078125, %v88_v45  ;;  %v424_v45 = vld [vmem:[#allocation3 + $0x10] sm:$0xff] }
  0xb4   :  { %v98_v48 = vmul.f32 0.0078125, %v92_v46 }
  0xb5   :  { %v100_v49 = vadd.f32 1e-06, %v96_v47 }
  0xb6   :  { %v90_v50 = vpop.xlane.xlu0 %89  ;;  %v102_v51 = vadd.f32 1e-06, %v98_v48 }
  0xb7   :  { %v94_v52 = vpop.xlane.xlu1 %93  ;;  %2363 = vrsqrt.f32 %v100_v49  ;;  %v97_v53 = vmul.f32 0.0078125, %v90_v50 }
  0xb8   :  { %v99_v54 = vmul.f32 0.0078125, %v94_v52  ;;  %2365 = vrsqrt.f32 %v102_v51 }
  0xb9   :  { %v101_v55 = vadd.f32 1e-06, %v97_v53 }
  0xba   :  { %v103_v56 = vadd.f32 1e-06, %v99_v54  ;;  %v443_v12 = vpop.permute.xlu0 %442 }
  0xbb   :  { %2367 = vrsqrt.f32 %v101_v55  ;;  %v445_v11 = vpop.permute.xlu1 %444 }
  0xbc   :  { %2369 = vrsqrt.f32 %v103_v56 }
  0xc4   :  { %v2364_v57 = vpop.eup %2363 }
  0xc5   :  { %v2366_v58 = vpop.eup %2365  ;;  %v108_v59 = vmul.f32 %v2364_v57, %v2647_v0 }
  0xc6   :  { %v110_v6 = vmul.f32 %v2366_v58, %v2657_v2 }
  0xc7   :  { %v118_v3 = vmul.f32 %v1983_v61, %v108_v59 }
  0xc8   :  { %v2368_v60 = vpop.eup %2367  ;;  %v120_v9 = vmul.f32 %v1983_v61, %v110_v6 }
  0xc9   :  { %v2370_v62 = vpop.eup %2369  ;;  %v109_v63 = vmul.f32 %v2368_v60, %v2652_v1  ;;  %v447_v1 = vpop.permute.xlu1 %446 }
  0xca   :  { %v111_v7 = vmul.f32 %v2370_v62, %v2666_v5  ;;  %v451_v5 = vsel %vm450_vm0, %v443_v12, %v445_v11 }
  0xcb   :  { %v119_v4 = vmul.f32 %v1983_v61, %v109_v63 }
  0xcc   :  { %v121_v10 = vmul.f32 %v1983_v61, %v111_v7 }
  0xcd   :  { %v122_v8 = vpack.c.bf16 %v119_v4, %v118_v3  ;;  %v449_v15 = vpop.permute.xlu1 %448 }
  0xce   :  { %v123_v0 = vpack.c.bf16 %v121_v10, %v120_v9  ;;  %v452_v21 = vsel %vm450_vm0, %v447_v1, %v449_v15 }
  0xcf   :  { %349 = vmatmul.mubr.bf16.vlgmr.msra.gmra.mxu0 %v122_v8  ;;  %402 = vmatmul.mubr.bf16.vlgmr.msra.gmra.mxu1 %v122_v8 }
  0xd0   :  { %358 = vmatprep.mubr.bf16.mxu0 %v2572_v36  ;;  %411 = vmatprep.mubr.bf16.mxu1 %v2572_v36 }
  0xd7   :  { %359 = vmatmul.mubr.bf16.gmra.mxu0 %v123_v0  ;;  %412 = vmatmul.mubr.bf16.gmra.mxu1 %v123_v0 }
 0x18f   :  { %v350_v13 = vpop.f32.mrf.mxu0  ;;  %v403_v2 = vpop.f32.mrf.mxu1 }
 0x190   :  { %v458_v14 = vmul.f32 %v451_v5, %v403_v2  ;;  %v426_v51 = vmul.f32 %v422_v43, %v350_v13 }
 0x191   :  { %v352_v16 = vpop.f32.mrf.mxu0  ;;  %v405_v17 = vpop.f32.mrf.mxu1 }
 0x192   :  { %v457_v18 = vmul.f32 %v443_v12, %v352_v16  ;;  %475 = vrot.lane.b32.xlu1 %v458_v14, %s2573_s18  ;;  %v427_v44 = vmul.f32 %v423_v39, %v352_v16 }
 0x193   :  { %v354_v19 = vpop.f32.mrf.mxu0  ;;  %v407_v20 = vpop.f32.mrf.mxu1 }
 0x194   :  { %v460_v22 = vmul.f32 %v452_v21, %v407_v20  ;;  %473 = vrot.lane.b32.xlu0 %v457_v18, %s2573_s18  ;;  %v428_v52 = vmul.f32 %v424_v45, %v354_v19 }
 0x195   :  { %v356_v23 = vpop.f32.mrf.mxu0  ;;  %v409_v24 = vpop.f32.mrf.mxu1 }
 0x196   :  { %v459_v25 = vmul.f32 %v447_v1, %v356_v23  ;;  %v2787_v26 = vpack.c.bf16 %v409_v24, %v405_v17  ;;  %479 = vrot.lane.b32.xlu1 %v460_v22, %s2573_s18  ;;  %v429_v46 = vmul.f32 %v425_v40, %v356_v23  ;;  %v2837_v17 = vld [vmem:[#allocation8] sm:$0xff]  ;;  %v2842_v24 = vld [vmem:[#allocation8 + $0x8] sm:$0xff] }
 0x197   :  { %v360_v27 = vpop.f32.mrf.mxu0  ;;  %v413_v28 = vpop.f32.mrf.mxu1 }
 0x198   :  { %v462_v29 = vmul.f32 %v451_v5, %v413_v28  ;;  %477 = vrot.lane.b32.xlu0 %v459_v25, %s2573_s18  ;;  %v430_v8 = vmul.f32 %v422_v43, %v360_v27 }
 0x199   :  { %v362_v30 = vpop.f32.mrf.mxu0  ;;  %v415_v31 = vpop.f32.mrf.mxu1 }
 0x19a   :  { %v461_v32 = vmul.f32 %v443_v12, %v362_v30  ;;  %483 = vrot.lane.b32.xlu1 %v462_v29, %s2573_s18  ;;  %v431_v62 = vmul.f32 %v423_v39, %v362_v30 }
 0x19b   :  { %v364_v33 = vpop.f32.mrf.mxu0  ;;  %v417_v34 = vpop.f32.mrf.mxu1 }
 0x19c   :  { %v464_v35 = vmul.f32 %v452_v21, %v417_v34  ;;  %481 = vrot.lane.b32.xlu0 %v461_v32, %s2573_s18  ;;  %v432_v9 = vmul.f32 %v424_v45, %v364_v33 }
 0x19d   :  { %v366_v37 = vpop.f32.mrf.mxu0  ;;  %v419_v10 = vpop.f32.mrf.mxu1 }
 0x19e   :  { %v463_v38 = vmul.f32 %v447_v1, %v366_v37  ;;  %487 = vrot.lane.b32.xlu1 %v464_v35, %s2573_s18  ;;  %v433_v63 = vmul.f32 %v425_v40, %v366_v37  ;;  %v2814_v2 = vpack.c.bf16 %v419_v10, %v415_v31 }
 0x1a0   :  { %485 = vrot.lane.b32.xlu0 %v463_v38, %s2573_s18 }
 0x204   :  { %v476_v41 = vpop.permute.xlu1 %475 }
 0x205   :  { %v502_v48 = vadd.f32 %v476_v41, %v427_v44 }
 0x206   :  { %v474_v42 = vpop.permute.xlu0 %473 }
 0x207   :  { %v489_v49 = vsel %vm450_vm0, %v474_v42, %v476_v41 }
 0x208   :  { %v480_v47 = vpop.permute.xlu1 %479  ;;  %v501_v56 = vadd.f32 %v489_v49, %v426_v51 }
 0x209   :  { %v504_v50 = vadd.f32 %v480_v47, %v429_v46 }
 0x20a   :  { %v478_v53 = vpop.permute.xlu0 %477 }
 0x20b   :  { %v2796_v54 = vpack.c.bf16 %v504_v50, %v502_v48  ;;  %v490_v55 = vsel %vm450_vm0, %v478_v53, %v480_v47 }
 0x20c   :  { %v503_v57 = vadd.f32 %v490_v55, %v428_v52  ;;  %v484_v58 = vpop.permute.xlu1 %483 }
 0x20d   :  { %2227 = vmatprep.subr.msk.bf16.mxu0 %vm523_vm1, %v2796_v54  ;;  %v531_v59 = vsel %vm523_vm1, %v2796_v54, 0  ;;  %v506_v4 = vadd.f32 %v484_v58, %v431_v62 }
 0x20e   :  { %v482_v60 = vpop.permute.xlu0 %481  ;;  %2160 = vmatpush3.bf16.xpose.msra.mxu0 %v531_v59  ;;  %v2803_v61 = vpack.c.bf16 %v503_v57, %v501_v56 }
 0x20f   :  { %2171 = vmatprep.subr.bf16.mxu0 %v2787_v26  ;;  %v491_v6 = vsel %vm450_vm0, %v482_v60, %v484_v58 }
 0x210   :  { %519 = vrot.lane.b32.xlu0 %v2803_v61, %s2574_s8  ;;  %2161 = vmatprep.mubr.msk.bf16.mxu0 %vm523_vm1, %v2803_v61  ;;  %v488_v3 = vpop.permute.xlu1 %487  ;;  %v505_v12 = vadd.f32 %v491_v6, %v430_v8 }
 0x211   :  { %v508_v7 = vadd.f32 %v488_v3, %v433_v63 }
 0x212   :  { %v486_v0 = vpop.permute.xlu0 %485 }
 0x213   :  { %v2811_v11 = vpack.c.bf16 %v508_v7, %v506_v4  ;;  %v492_v1 = vsel %vm450_vm0, %v486_v0, %v488_v3 }
 0x214   :  { %v507_v13 = vadd.f32 %v492_v1, %v432_v9 }
 0x215   :  { %2228 = vmatprep.subr.msk.bf16.mxu1 %vm523_vm1, %v2811_v11  ;;  %v589_v5 = vsel %vm523_vm1, %v2811_v11, 0 }
 0x216   :  { %2166 = vmatpush3.bf16.xpose.msra.mxu1 %v589_v5  ;;  %v2820_v14 = vpack.c.bf16 %v507_v13, %v505_v12 }
 0x217   :  { %2177 = vmatprep.subr.bf16.mxu1 %v2814_v2 }
 0x218   :  { %521 = vrot.lane.b32.xlu1 %v2820_v14, %s2574_s8  ;;  %2167 = vmatprep.mubr.msk.bf16.mxu1 %vm523_vm1, %v2820_v14 }
 0x282   :  { %v2827_v15 = vpop.permute.xlu0 %519 }
 0x283   :  { %2162 = vmatmul.mubr.msk.bf16.vlgmr.msra.gmra.mxu0 %vm523_vm1, %v2827_v15 }
 0x284   :  { %2172 = vmatpush3.bf16.msra.mxu0 %v2787_v26 }
 0x28a   :  { %v2832_v16 = vpop.permute.xlu1 %521 }
 0x28b   :  { %2168 = vmatmul.mubr.msk.bf16.vlgmr.msra.gmra.mxu1 %vm523_vm1, %v2832_v16 }
 0x28c   :  { %2178 = vmatpush3.bf16.msra.mxu1 %v2814_v2 }
 0x343   :  { %v2163_v18 = vpop.f32.mrf.mxu0 }
 0x344   :  { %v576_v19 = vadd.f32 %v2163_v18, %v2837_v17 }
 0x345   :  { %v567_v20 = vpop.f32.mrf.mxu0 }
 0x346   :  { %v568_v21 = vadd.f32 %v567_v20, %v2837_v17  ;;  %v647_v22 = vsel %vm640_vm2, %v576_v19, -inf }
 0x347   :  { %648 = vmax.xlane.f32.xlu0 %v647_v22  ;;  %v2164_v23 = vpop.f32.mrf.mxu0 }
 0x348   :  { %v579_v27 = vadd.f32 %v2164_v23, %v2842_v24  ;;  %v641_v29 = vsel %vm640_vm2, %v568_v21, -inf }
 0x349   :  { %v570_v25 = vpop.f32.mrf.mxu0 }
 0x34a   :  { %v571_v28 = vadd.f32 %v570_v25, %v2842_v24  ;;  %v650_v34 = vsel %vm640_vm2, %v579_v27, -inf }
 0x34b   :  { %642 = vmax.xlane.f32.xlu0 %v641_v29  ;;  %v2169_v30 = vpop.f32.mrf.mxu1 }
 0x34c   :  { %v644_v31 = vsel %vm640_vm2, %v571_v28, -inf  ;;  %v634_v38 = vadd.f32 %v2169_v30, %v2837_v17 }
 0x34d   :  { %645 = vmax.xlane.f32.xlu1 %v644_v31  ;;  %v625_v32 = vpop.f32.mrf.mxu1 }
 0x34e   :  { %v626_v33 = vadd.f32 %v625_v32, %v2837_v17  ;;  %v659_v43 = vsel %vm640_vm2, %v634_v38, -inf }
 0x34f   :  { %651 = vmax.xlane.f32.xlu0 %v650_v34  ;;  %v2170_v35 = vpop.f32.mrf.mxu1 }
 0x350   :  { %v653_v40 = vsel %vm640_vm2, %v626_v33, -inf  ;;  %v637_v41 = vadd.f32 %v2170_v35, %v2842_v24 }
 0x351   :  { %v628_v37 = vpop.f32.mrf.mxu1 }
 0x352   :  { %v629_v39 = vadd.f32 %v628_v37, %v2842_v24  ;;  %v662_v44 = vsel %vm640_vm2, %v637_v41, -inf }
 0x353   :  { %654 = vmax.xlane.f32.xlu0 %v653_v40 }
 0x354   :  { %v656_v42 = vsel %vm640_vm2, %v629_v39, -inf }
 0x355   :  { %657 = vmax.xlane.f32.xlu1 %v656_v42 }
 0x357   :  { %660 = vmax.xlane.f32.xlu0 %v659_v43 }
 0x359   :  { %663 = vmax.xlane.f32.xlu1 %v662_v44 }
 0x3d0   :  { %v649_v45 = vpop.xlane.xlu0 %648 }
 0x3d1   :  { %v667_v46 = vsub.f32 %v576_v19, %v649_v45 }
 0x3d3   :  { %v677_v47 = vmul.f32 1.442695, %v667_v46 }
 0x3d4   :  { %v643_v48 = vpop.xlane.xlu0 %642 }
 0x3d5   :  { %2371 = vpow2.f32 %v677_v47  ;;  %v665_v49 = vsub.f32 %v568_v21, %v643_v48 }
 0x3d6   :  { %v646_v50 = vpop.xlane.xlu1 %645 }
 0x3d7   :  { %v673_v51 = vmul.f32 1.442695, %v665_v49  ;;  %v666_v52 = vsub.f32 %v571_v28, %v646_v50 }
 0x3d8   :  { %v652_v53 = vpop.xlane.xlu0 %651 }
 0x3d9   :  { %2373 = vpow2.f32 %v673_v51  ;;  %v668_v55 = vsub.f32 %v579_v27, %v652_v53  ;;  %v675_v56 = vmul.f32 1.442695, %v666_v52 }
 0x3db   :  { %v679_v57 = vmul.f32 1.442695, %v668_v55 }
 0x3dc   :  { %v655_v58 = vpop.xlane.xlu0 %654 }
 0x3dd   :  { %2375 = vpow2.f32 %v679_v57  ;;  %v669_v59 = vsub.f32 %v626_v33, %v655_v58 }
 0x3de   :  { %2377 = vpow2.f32 %v675_v56  ;;  %v658_v19 = vpop.xlane.xlu1 %657 }
 0x3df   :  { %v681_v3 = vmul.f32 1.442695, %v669_v59  ;;  %v670_v22 = vsub.f32 %v629_v39, %v658_v19 }
 0x3e0   :  { %v661_v60 = vpop.xlane.xlu0 %660 }
 0x3e1   :  { %v671_v62 = vsub.f32 %v634_v38, %v661_v60  ;;  %v683_v25 = vmul.f32 1.442695, %v670_v22 }
 0x3e2   :  { %v2857_v63 = vpop.eup %2371  ;;  %v664_v20 = vpop.xlane.xlu1 %663 }
 0x3e3   :  { %v685_v4 = vmul.f32 1.442695, %v671_v62  ;;  %v695_v6 = vsel %vm640_vm2, %v2857_v63, 0.0  ;;  %v672_v21 = vsub.f32 %v637_v41, %v664_v20 }
 0x3e4   :  { %696 = vadd.xlane.f32.xlu0 %v695_v6 }
 0x3e5   :  { %2379 = vpow2.f32 %v685_v4  ;;  %v687_v23 = vmul.f32 1.442695, %v672_v21 }
 0x3e6   :  { %v2374_v7 = vpop.eup %2373  ;;  %2381 = vpow2.f32 %v681_v3 }
 0x3e7   :  { %v689_v8 = vsel %vm640_vm2, %v2374_v7, 0.0  ;;  %2383 = vpow2.f32 %v687_v23 }
 0x3e8   :  { %690 = vadd.xlane.f32.xlu0 %v689_v8  ;;  %2385 = vpow2.f32 %v683_v25 }
 0x3ea   :  { %v2376_v9 = vpop.eup %2375 }
 0x3eb   :  { %v698_v10 = vsel %vm640_vm2, %v2376_v9, 0.0  ;;  %v2378_v0 = vpop.eup %2377 }
 0x3ec   :  { %699 = vadd.xlane.f32.xlu1 %v698_v10  ;;  %v692_v1 = vsel %vm640_vm2, %v2378_v0, 0.0 }
 0x3f0   :  { %693 = vadd.xlane.f32.xlu1 %v692_v1 }
 0x3f2   :  { %v2864_v12 = vpop.eup %2379 }
 0x3f3   :  { %v707_v13 = vsel %vm640_vm2, %v2864_v12, 0.0  ;;  %v2868_v5 = vpop.eup %2381 }
 0x3f4   :  { %708 = vadd.xlane.f32.xlu0 %v707_v13  ;;  %v701_v18 = vsel %vm640_vm2, %v2868_v5, 0.0  ;;  %v2384_v27 = vpop.eup %2383 }
 0x3f5   :  { %v2386_v28 = vpop.eup %2385 }
 0x3f8   :  { %702 = vadd.xlane.f32.xlu0 %v701_v18 }
 0x401   :  { %938 = vrot.lane.b32.xlu1 %v2811_v11, %s2574_s8  ;;  %v710_v11 = vsel %vm640_vm2, %v2384_v27, 0.0 }
 0x405   :  { %868 = vrot.lane.b32.xlu1 %v2803_v61, %s2573_s18  ;;  %v704_v61 = vsel %vm640_vm2, %v2386_v28, 0.0 }
 0x40e   :  { %873 = vrot.lane.b32.xlu0 %v2796_v54, %s2574_s8 }
 0x412   :  { %933 = vrot.lane.b32.xlu0 %v2820_v14, %s2573_s18 }
 0x429   :  { %711 = vadd.xlane.f32.xlu1 %v710_v11 }
 0x42d   :  { %705 = vadd.xlane.f32.xlu1 %v704_v61 }
 0x43e   :  { %870 = vrot.lane.b32.xlu1 %v2827_v15, %s2573_s18 }
 0x442   :  { %935 = vrot.lane.b32.xlu1 %v2832_v16, %s2573_s18 }
 0x46d   :  { %v697_v54 = vpop.xlane.xlu0 %696 }
 0x471   :  { %v691_v14 = vpop.xlane.xlu0 %690 }
 0x475   :  { %v700_v29 = vpop.xlane.xlu1 %699 }
 0x476   :  { %2387 = vrcp.f32 %v700_v29 }
 0x477   :  { %2389 = vrcp.f32 %v691_v14 }
 0x478   :  { %2391 = vrcp.f32 %v697_v54 }
 0x479   :  { %v694_v30 = vpop.xlane.xlu1 %693 }
 0x47a   :  { %2393 = vrcp.f32 %v694_v30 }
 0x47d   :  { %v939_v31 = vpop.permute.xlu1 %938  ;;  %v709_v32 = vpop.xlane.xlu0 %708 }
 0x47e   :  { %2230 = vmatprep.subr.msk.bf16.mxu1 %vm523_vm1, %v939_v31  ;;  %v947_v60 = vsel %vm523_vm1, %v939_v31, 0 }
 0x481   :  { %v703_v33 = vpop.xlane.xlu0 %702  ;;  %v869_v44 = vpop.permute.xlu1 %868 }
 0x483   :  { %v2388_v34 = vpop.eup %2387 }
 0x484   :  { %v2390_v35 = vpop.eup %2389  ;;  %v724_v38 = vmul.f32 %v2388_v34, %v2376_v9 }
 0x485   :  { %v874_v37 = vpop.permute.xlu0 %873  ;;  %v2392_v15 = vpop.eup %2391  ;;  %v721_v39 = vmul.f32 %v2390_v35, %v2374_v7 }
 0x486   :  { %2229 = vmatprep.subr.msk.bf16.mxu0 %vm523_vm1, %v874_v37  ;;  %v723_v41 = vmul.f32 %v2392_v15, %v2857_v63  ;;  %v882_v45 = vsel %vm523_vm1, %v874_v37, 0 }
 0x487   :  { %v2394_v16 = vpop.eup %2393 }
 0x488   :  { %v722_v40 = vmul.f32 %v2394_v16, %v2378_v0  ;;  %v730_v43 = vpack.c.bf16 %v724_v38, %v723_v41 }
 0x489   :  { %v934_v62 = vpop.permute.xlu0 %933 }
 0x48a   :  { %v729_v42 = vpack.c.bf16 %v722_v40, %v721_v39 }
 0x48c   :  { %2173 = vmatprep.mubr.msk.bf16.mxu0 %vm640_vm2, %v729_v42 }
 0x48d   :  { %2174 = vmatmul.mubr.msk.bf16.vlgmr.msra.gmra.mxu0 %vm640_vm2, %v730_v43 }
 0x48e   :  { %2184 = vmatpush3.bf16.xpose.msra.mxu0 %v882_v45  ;;  %2185 = vmatprep.mubr.msk.bf16.mxu0 %vm523_vm1, %v869_v44 }
 0x4b2   :  { %v712_v46 = vpop.xlane.xlu1 %711 }
 0x4b3   :  { %2395 = vrcp.f32 %v712_v46 }
 0x4b4   :  { %2397 = vrcp.f32 %v703_v33 }
 0x4b5   :  { %2399 = vrcp.f32 %v709_v32 }
 0x4b6   :  { %v706_v47 = vpop.xlane.xlu1 %705 }
 0x4b7   :  { %2401 = vrcp.f32 %v706_v47 }
 0x4ba   :  { %v871_v48 = vpop.permute.xlu1 %870 }
 0x4bb   :  { %2186 = vmatmul.mubr.msk.bf16.vlgmr.msra.gmra.mxu0 %vm523_vm1, %v871_v48 }
 0x4be   :  { %v936_v63 = vpop.permute.xlu1 %935 }
 0x4c0   :  { %v2396_v49 = vpop.eup %2395 }
 0x4c1   :  { %v2398_v50 = vpop.eup %2397  ;;  %v728_v53 = vmul.f32 %v2396_v49, %v2384_v27 }
 0x4c2   :  { %v2400_v51 = vpop.eup %2399  ;;  %v725_v55 = vmul.f32 %v2398_v50, %v2868_v5 }
 0x4c3   :  { %v727_v57 = vmul.f32 %v2400_v51, %v2864_v12 }
 0x4c4   :  { %v2402_v52 = vpop.eup %2401 }
 0x4c5   :  { %v726_v56 = vmul.f32 %v2402_v52, %v2386_v28  ;;  %v732_v59 = vpack.c.bf16 %v728_v53, %v727_v57 }
 0x4c7   :  { %v731_v58 = vpack.c.bf16 %v726_v56, %v725_v55 }
 0x4c9   :  { %2179 = vmatprep.mubr.msk.bf16.mxu1 %vm640_vm2, %v731_v58 }
 0x4ca   :  { %2180 = vmatmul.mubr.msk.bf16.vlgmr.msra.gmra.mxu1 %vm640_vm2, %v732_v59 }
 0x4cb   :  { %2190 = vmatpush3.bf16.xpose.msra.mxu1 %v947_v60  ;;  %2191 = vmatprep.mubr.msk.bf16.mxu1 %vm523_vm1, %v934_v62 }
 0x4d2   :  { %2192 = vmatmul.mubr.msk.bf16.vlgmr.msra.gmra.mxu1 %vm523_vm1, %v936_v63 }
 0x54d   :  { %v2901_v3 = vpop.f32.mrf.mxu0 }
 0x54f   :  { %v773_v4 = vpop.f32.mrf.mxu0 }
 0x550   :  { %843 = vst.msk [vmem:[#allocation2] sm:$0xff] %vm523_vm1, %v773_v4 }
 0x551   :  { %v2904_v6 = vpop.f32.mrf.mxu0 }
 0x553   :  { %v776_v7 = vpop.f32.mrf.mxu0 }
 0x554   :  { %844 = vst.msk [vmem:[#allocation2 + $0x8] sm:$0xff] %vm523_vm1, %v776_v7 }
 0x57b   :  { %v2187_v8 = vpop.f32.mrf.mxu0 }
 0x57c   :  { %v927_v9 = vadd.f32 %v2187_v8, %v2837_v17 }
 0x57d   :  { %v918_v10 = vpop.f32.mrf.mxu0 }
 0x57e   :  { %v919_v0 = vadd.f32 %v918_v10, %v2837_v17  ;;  %v1004_v1 = vsel %vm640_vm2, %v927_v9, -inf }
 0x57f   :  { %1005 = vmax.xlane.f32.xlu0 %v1004_v1  ;;  %v2188_v12 = vpop.f32.mrf.mxu0 }
 0x580   :  { %v930_v5 = vadd.f32 %v2188_v12, %v2842_v24  ;;  %v998_v19 = vsel %vm640_vm2, %v919_v0, -inf }
 0x581   :  { %v921_v13 = vpop.f32.mrf.mxu0 }
 0x582   :  { %v922_v18 = vadd.f32 %v921_v13, %v2842_v24  ;;  %v1007_v21 = vsel %vm640_vm2, %v930_v5, -inf }
 0x583   :  { %999 = vmax.xlane.f32.xlu0 %v998_v19 }
 0x584   :  { %v1001_v20 = vsel %vm640_vm2, %v922_v18, -inf }
 0x585   :  { %1002 = vmax.xlane.f32.xlu1 %v1001_v20 }
 0x587   :  { %1008 = vmax.xlane.f32.xlu0 %v1007_v21 }
 0x58a   :  { %v2915_v22 = vpop.f32.mrf.mxu1 }
 0x58c   :  { %v828_v23 = vpop.f32.mrf.mxu1 }
 0x58d   :  { %845 = vst.msk [vmem:[#allocation2 + $0x10] sm:$0xff] %vm523_vm1, %v828_v23 }
 0x58e   :  { %v2918_v25 = vpop.f32.mrf.mxu1 }
 0x590   :  { %v831_v27 = vpop.f32.mrf.mxu1 }
 0x591   :  { %846 = vst.msk [vmem:[#allocation2 + $0x18] sm:$0xff] %vm523_vm1, %v831_v27 }
 0x592   :  { %v2193_v11 = vpop.f32.mrf.mxu1 }
 0x593   :  { %v992_v14 = vadd.f32 %v2193_v11, %v2837_v17 }
 0x594   :  { %v983_v28 = vpop.f32.mrf.mxu1 }
 0x595   :  { %v984_v61 = vadd.f32 %v983_v28, %v2837_v17  ;;  %v1016_v34 = vsel %vm640_vm2, %v992_v14, -inf }
 0x596   :  { %v2194_v54 = vpop.f32.mrf.mxu1 }
 0x597   :  { %v1010_v29 = vsel %vm640_vm2, %v984_v61, -inf  ;;  %v995_v32 = vadd.f32 %v2194_v54, %v2842_v24 }
 0x598   :  { %v986_v30 = vpop.f32.mrf.mxu1  ;;  %1011 = vmax.xlane.f32.xlu0 %v1010_v29 }
 0x599   :  { %v987_v31 = vadd.f32 %v986_v30, %v2842_v24  ;;  %v1019_v35 = vsel %vm640_vm2, %v995_v32, -inf }
 0x59b   :  { %v1013_v33 = vsel %vm640_vm2, %v987_v31, -inf }
 0x59c   :  { %1014 = vmax.xlane.f32.xlu1 %v1013_v33  ;;  %1017 = vmax.xlane.f32.xlu0 %v1016_v34 }
 0x5a0   :  { %1020 = vmax.xlane.f32.xlu1 %v1019_v35 }
 0x608   :  { %v1006_v37 = vpop.xlane.xlu0 %1005 }
 0x609   :  { %v1024_v15 = vsub.f32 %v927_v9, %v1006_v37 }
 0x60b   :  { %v1034_v17 = vmul.f32 1.442695, %v1024_v15 }
 0x60c   :  { %v1000_v16 = vpop.xlane.xlu0 %999 }
 0x60d   :  { %2403 = vpow2.f32 %v1034_v17  ;;  %v1022_v38 = vsub.f32 %v919_v0, %v1000_v16 }
 0x60e   :  { %v1003_v39 = vpop.xlane.xlu1 %1002 }
 0x60f   :  { %v1030_v40 = vmul.f32 1.442695, %v1022_v38  ;;  %v1023_v41 = vsub.f32 %v922_v18, %v1003_v39 }
 0x610   :  { %v1009_v42 = vpop.xlane.xlu0 %1008 }
 0x611   :  { %2405 = vpow2.f32 %v1030_v40  ;;  %v1025_v24 = vsub.f32 %v930_v5, %v1009_v42  ;;  %v1032_v43 = vmul.f32 1.442695, %v1023_v41 }
 0x613   :  { %v1036_v44 = vmul.f32 1.442695, %v1025_v24 }
 0x615   :  { %2407 = vpow2.f32 %v1036_v44  ;;  %v2291_v44 = vld [vmem:[%s3211_s5 + $0x38] sm:$0xff]  }
 0x616   :  { %2409 = vpow2.f32 %v1032_v43 }
 0x61a   :  { %v2929_v45 = vpop.eup %2403 }
 0x61b   :  { %v1052_v46 = vsel %vm640_vm2, %v2929_v45, 0.0 }
 0x61c   :  { %1053 = vadd.xlane.f32.xlu0 %v1052_v46  ;;  %v2293_v46 = vld [vmem:[%s3211_s5 + $0x28] sm:$0xff]  }
 0x61e   :  { %v2406_v47 = vpop.eup %2405 }
 0x61f   :  { %v1046_v48 = vsel %vm640_vm2, %v2406_v47, 0.0 }
 0x620   :  { %1047 = vadd.xlane.f32.xlu0 %v1046_v48 }
 0x621   :  { %v1012_v49 = vpop.xlane.xlu0 %1011 }
 0x622   :  { %v2934_v50 = vpop.eup %2407  ;;  %v1026_v53 = vsub.f32 %v984_v61, %v1012_v49 }
 0x623   :  { %v1055_v51 = vsel %vm640_vm2, %v2934_v50, 0.0  ;;  %v2410_v52 = vpop.eup %2409 }
 0x624   :  { %1056 = vadd.xlane.f32.xlu1 %v1055_v51  ;;  %v1049_v58 = vsel %vm640_vm2, %v2410_v52, 0.0  ;;  %v1038_v62 = vmul.f32 1.442695, %v1026_v53  ;;  %v2295_v51 = vld [vmem:[%s3211_s5 + $0x18] sm:$0xff]   ;;  %v2296_v53 = vld [vmem:[%s3211_s5 + $0x10] sm:$0xff]  }
 0x625   :  { %v1015_v55 = vpop.xlane.xlu1 %1014  ;;  %v1018_v56 = vpop.xlane.xlu0 %1017 }
 0x626   :  { %v1028_v57 = vsub.f32 %v992_v14, %v1018_v56  ;;  %v1027_v59 = vsub.f32 %v987_v31, %v1015_v55  ;;  %v2297_v55 = vld [vmem:[%s3211_s5 + $0x8] sm:$0xff]   ;;  %v2298_v56 = vld [vmem:[%s3211_s5] sm:$0xff]  }
 0x628   :  { %v1042_v60 = vmul.f32 1.442695, %v1028_v57  ;;  %1050 = vadd.xlane.f32.xlu1 %v1049_v58  ;;  %v1040_v7 = vmul.f32 1.442695, %v1027_v59 }
 0x629   :  { %v1021_v63 = vpop.xlane.xlu1 %1020 }
 0x62a   :  { %v1029_v4 = vsub.f32 %v995_v32, %v1021_v63  ;;  %2411 = vpow2.f32 %v1042_v60 }
 0x62b   :  { %2413 = vpow2.f32 %v1038_v62 }
 0x62c   :  { %v1044_v8 = vmul.f32 1.442695, %v1029_v4 }
 0x62e   :  { %2415 = vpow2.f32 %v1044_v8 }
 0x62f   :  { %2417 = vpow2.f32 %v1040_v7 }
 0x637   :  { %v2939_v9 = vpop.eup %2411 }
 0x638   :  { %v1064_v10 = vsel %vm640_vm2, %v2939_v9, 0.0  ;;  %v2943_v0 = vpop.eup %2413 }
 0x639   :  { %1065 = vadd.xlane.f32.xlu0 %v1064_v10  ;;  %v1058_v5 = vsel %vm640_vm2, %v2943_v0, 0.0 }
 0x63b   :  { %v2416_v1 = vpop.eup %2415 }
 0x63c   :  { %v1067_v12 = vsel %vm640_vm2, %v2416_v1, 0.0  ;;  %v2418_v13 = vpop.eup %2417 }
 0x63d   :  { %1068 = vadd.xlane.f32.xlu1 %v1067_v12  ;;  %1059 = vadd.xlane.f32.xlu0 %v1058_v5  ;;  %v1061_v18 = vsel %vm640_vm2, %v2418_v13, 0.0 }
 0x641   :  { %1062 = vadd.xlane.f32.xlu1 %v1061_v18 }
 0x652   :  { %1150 = vrot.lane.b32.xlu1 %v2814_v2, %s2574_s8 }
 0x653   :  { %1091 = vrot.lane.b32.xlu0 %v2787_v26, %s2574_s8 }
 0x656   :  { %851 = vrot.lane.b32.xlu1 %v2901_v3, %s2575_s20 }
 0x657   :  { %855 = vrot.lane.b32.xlu0 %v2915_v22, %s2575_s20 }
 0x65a   :  { %853 = vrot.lane.b32.xlu1 %v2904_v6, %s2575_s20 }
 0x65e   :  { %857 = vrot.lane.b32.xlu1 %v2918_v25, %s2575_s20 }
 0x6a5   :  { %v1054_v19 = vpop.xlane.xlu0 %1053 }
 0x6a9   :  { %v1048_v20 = vpop.xlane.xlu0 %1047 }
 0x6aa   :  { %2419 = vrcp.f32 %v1048_v20  ;;  %v2299_v20 = vld [vmem:[%s3212_s6 + $0xe0] ss:$16 sps:$4 sm:$0xff]  }
 0x6ad   :  { %v1057_v21 = vpop.xlane.xlu1 %1056 }
 0x6b1   :  { %v1051_v23 = vpop.xlane.xlu1 %1050 }
 0x6b2   :  { %2421 = vrcp.f32 %v1051_v23  ;;  %v2302_v23 = vld [vmem:[%s3212_s6 + $0xe8] ss:$16 sps:$4 sm:$0xff]  }
 0x6b3   :  { %2423 = vrcp.f32 %v1057_v21  ;;  %v2301_v21 = vld [vmem:[%s3212_s6 + $0xe4] ss:$16 sps:$4 sm:$0xff]  }
 0x6b4   :  { %2425 = vrcp.f32 %v1054_v19 }
 0x6b7   :  { %v2420_v2 = vpop.eup %2419 }
 0x6b8   :  { %v1078_v26 = vmul.f32 %v2420_v2, %v2406_v47  ;;  %v2294_v47 = vld [vmem:[%s3211_s5 + $0x20] sm:$0xff]   ;;  %v2304_v2 = vld [vmem:[%s3212_s6 + $0xec] ss:$16 sps:$4 sm:$0xff]  }
 0x6bf   :  { %v2422_v27 = vpop.eup %2421 }
 0x6c0   :  { %v1079_v11 = vmul.f32 %v2422_v27, %v2410_v52  ;;  %v2424_v6 = vpop.eup %2423 }
 0x6c1   :  { %v2426_v25 = vpop.eup %2425  ;;  %v1081_v14 = vmul.f32 %v2424_v6, %v2934_v50 }
 0x6c2   :  { %v1086_v28 = vpack.c.bf16 %v1079_v11, %v1078_v26  ;;  %v1066_v3 = vpop.xlane.xlu0 %1065  ;;  %v1080_v30 = vmul.f32 %v2426_v25, %v2929_v45  ;;  %v2292_v45 = vld [vmem:[%s3211_s5 + $0x30] sm:$0xff]   ;;  %v2475_v11 = vld [vmem:[%s3206_s0] sm:$0xff] }
 0x6c4   :  { %2197 = vmatprep.mubr.msk.bf16.mxu0 %vm640_vm2, %v1086_v28  ;;  %v1087_v32 = vpack.c.bf16 %v1081_v14, %v1080_v30 }
 0x6c6   :  { %v1069_v22 = vpop.xlane.xlu1 %1068  ;;  %v1060_v61 = vpop.xlane.xlu0 %1059 }
 0x6c7   :  { %2427 = vrcp.f32 %v1069_v22  ;;  %v2476_v22 = vld [vmem:[%s3206_s0 + $0x10] sm:$0xff] }
 0x6c8   :  { %2429 = vrcp.f32 %v1060_v61 }
 0x6c9   :  { %2431 = vrcp.f32 %v1066_v3 }
 0x6ca   :  { %v1063_v54 = vpop.xlane.xlu1 %1062  ;;  %v1092_v29 = vpop.permute.xlu0 %1091 }
 0x6cb   :  { %2433 = vrcp.f32 %v1063_v54  ;;  %2195 = vmatprep.subr.bf16.mxu0 %v1092_v29  ;;  %v2477_v54 = vld [vmem:[%s3206_s0 + $0x8] sm:$0xff] }
 0x6cc   :  { %2196 = vmatpush3.bf16.msra.mxu0 %v1092_v29  ;;  %v2478_v29 = vld [vmem:[%s3206_s0 + $0x18] sm:$0xff] }
 0x6cd   :  { %2207 = vmatprep.subr.bf16.mxu0 %v2291_v44 }
 0x6ce   :  { %v1151_v31 = vpop.permute.xlu1 %1150  ;;  %v856_v33 = vpop.permute.xlu0 %855 }
 0x6cf   :  { %2201 = vmatprep.subr.bf16.mxu1 %v1151_v31  ;;  %866 = vst.msk [vmem:[#allocation2 + $0x10] sm:$0xff] %vm863_vm3, %v856_v33  ;;  %2198 = vmatmul.mubr.msk.bf16.vlgmr.msra.gmra.mxu0 %vm640_vm2, %v1087_v32 }
 0x6d0   :  { %2202 = vmatpush3.bf16.msra.mxu1 %v1151_v31  ;;  %2208 = vmatpush3.bf16.msra.mxu0 %v2291_v44  ;;  %v2328_v44 = vld [vmem:[%s3212_s6 + $0x6c] ss:$16 sps:$4 sm:$0xff]  }
 0x6d1   :  { %2209 = vmatprep.subr.bf16.mxu0 %v2292_v45  ;;  %1606 = vmatprep.subr.bf16.mxu1 %v2301_v21 }
 0x6d2   :  { %v852_v34 = vpop.permute.xlu1 %851 }
 0x6d3   :  { %864 = vst.msk [vmem:[#allocation2] sm:$0xff] %vm863_vm3, %v852_v34  ;;  %v2307_v34 = vld [vmem:[%s3212_s6 + $0xc4] ss:$16 sps:$4 sm:$0xff]  }
 0x6d4   :  { %v2428_v35 = vpop.eup %2427  ;;  %2210 = vmatpush3.bf16.msra.mxu0 %v2292_v45  ;;  %v2323_v45 = vld [vmem:[%s3212_s6 + $0x60] ss:$16 sps:$4 sm:$0xff]  }
 0x6d5   :  { %v2430_v37 = vpop.eup %2429  ;;  %v1085_v38 = vmul.f32 %v2428_v35, %v2416_v1  ;;  %2211 = vmatprep.subr.bf16.mxu0 %v2293_v46  ;;  %v2310_v35 = vld [vmem:[%s3212_s6 + $0xcc] ss:$16 sps:$4 sm:$0xff]  }
 0x6d6   :  { %v854_v15 = vpop.permute.xlu1 %853  ;;  %v2432_v17 = vpop.eup %2431  ;;  %v1082_v39 = vmul.f32 %v2430_v37, %v2943_v0  ;;  %v2305_v37 = vld [vmem:[%s3212_s6 + $0xc0] ss:$16 sps:$4 sm:$0xff]  }
 0x6d7   :  { %865 = vst.msk [vmem:[#allocation2 + $0x8] sm:$0xff] %vm863_vm3, %v854_v15  ;;  %v1084_v42 = vmul.f32 %v2432_v17, %v2939_v9  ;;  %v2308_v15 = vld [vmem:[%s3212_s6 + $0xc8] ss:$16 sps:$4 sm:$0xff]   ;;  %v2313_v17 = vld [vmem:[%s3212_s6 + $0xa4] ss:$16 sps:$4 sm:$0xff]  }
 0x6d8   :  { %v2434_v16 = vpop.eup %2433  ;;  %2212 = vmatpush3.bf16.msra.mxu0 %v2293_v46  ;;  %v2326_v46 = vld [vmem:[%s3212_s6 + $0x68] ss:$16 sps:$4 sm:$0xff]  }
 0x6d9   :  { %v1083_v40 = vmul.f32 %v2434_v16, %v2418_v13  ;;  %v1089_v43 = vpack.c.bf16 %v1085_v38, %v1084_v42  ;;  %2213 = vmatprep.subr.bf16.mxu0 %v2294_v47  ;;  %v2316_v16 = vld [vmem:[%s3212_s6 + $0xac] ss:$16 sps:$4 sm:$0xff]   ;;  %v2311_v38 = vld [vmem:[%s3212_s6 + $0xa0] ss:$16 sps:$4 sm:$0xff]  }
 0x6da   :  { %v858_v41 = vpop.permute.xlu1 %857  ;;  %v2317_v42 = vld [vmem:[%s3212_s6 + $0x80] ss:$16 sps:$4 sm:$0xff]  }
 0x6db   :  { %867 = vst.msk [vmem:[#allocation2 + $0x18] sm:$0xff] %vm863_vm3, %v858_v41  ;;  %v1088_v24 = vpack.c.bf16 %v1083_v40, %v1082_v39  ;;  %v2314_v39 = vld [vmem:[%s3212_s6 + $0xa8] ss:$16 sps:$4 sm:$0xff]   ;;  %v2319_v40 = vld [vmem:[%s3212_s6 + $0x84] ss:$16 sps:$4 sm:$0xff]  }
 0x6dc   :  { %2214 = vmatpush3.bf16.msra.mxu0 %v2294_v47  ;;  %v2322_v41 = vld [vmem:[%s3212_s6 + $0x8c] ss:$16 sps:$4 sm:$0xff]   ;;  %v2331_v47 = vld [vmem:[%s3212_s6 + $0x44] ss:$16 sps:$4 sm:$0xff]  }
 0x6dd   :  { %2203 = vmatprep.mubr.msk.bf16.mxu1 %vm640_vm2, %v1088_v24  ;;  %2215 = vmatprep.subr.bf16.mxu0 %v2295_v51  ;;  %v2320_v24 = vld [vmem:[%s3212_s6 + $0x88] ss:$16 sps:$4 sm:$0xff]  }
 0x6de   :  { %2204 = vmatmul.mubr.msk.bf16.vlgmr.msra.gmra.mxu1 %vm640_vm2, %v1089_v43  ;;  %v2325_v43 = vld [vmem:[%s3212_s6 + $0x64] ss:$16 sps:$4 sm:$0xff]  }
 0x6df   :  { %1638 = vmatprep.mubr.bf16.mxu1 %v2572_v36  ;;  %1607 = vmatpush1.bf16.msra.mxu1 %v2299_v20  ;;  %v2040_v20 = vld [vmem:[%s3215_s9] ss:$0 sm:$0xff] }
 0x6e0   :  { %2216 = vmatpush3.bf16.msra.mxu0 %v2295_v51  ;;  %1608 = vmatprep.subr.bf16.mxu1 %v2307_v34  ;;  %v2337_v51 = vld [vmem:[%s3212_s6 + $0x24] ss:$16 sps:$4 sm:$0xff]   ;;  %v2352_v34 = vld [vmem:[%s3213_s7 + $0x28] sm:$0xff]  }
 0x6e1   :  { %2217 = vmatprep.subr.bf16.mxu0 %v2296_v53 }
 0x6e3   :  { %1609 = vmatpush1.bf16.msra.mxu1 %v2305_v37  ;;  %v2354_v37 = vld [vmem:[%s3213_s7 + $0x20] sm:$0xff]  }
 0x6e4   :  { %2218 = vmatpush3.bf16.msra.mxu0 %v2296_v53  ;;  %1610 = vmatprep.subr.bf16.mxu1 %v2313_v17  ;;  %v2335_v53 = vld [vmem:[%s3212_s6 + $0x20] ss:$16 sps:$4 sm:$0xff]   ;;  %v2356_v17 = vld [vmem:[%s3213_s7 + $0x18] sm:$0xff]  }
 0x6e5   :  { %2219 = vmatprep.subr.bf16.mxu0 %v2297_v55 }
 0x6e7   :  { %1611 = vmatpush1.bf16.msra.mxu1 %v2311_v38  ;;  %v2358_v38 = vld [vmem:[%s3213_s7 + $0x10] sm:$0xff]  }
 0x6e8   :  { %2220 = vmatpush3.bf16.msra.mxu0 %v2297_v55  ;;  %1612 = vmatprep.subr.bf16.mxu1 %v2319_v40  ;;  %v2338_v55 = vld [vmem:[%s3212_s6 + $0x28] ss:$16 sps:$4 sm:$0xff]  }
 0x6e9   :  { %2221 = vmatprep.subr.bf16.mxu0 %v2298_v56  ;;  %v2360_v40 = vld [vmem:[%s3213_s7 + $0x8] sm:$0xff]  }
 0x6eb   :  { %1613 = vmatpush1.bf16.msra.mxu1 %v2317_v42  ;;  %v2362_v42 = vld [vmem:[%s3213_s7] sm:$0xff]  }
 0x6ec   :  { %2222 = vmatpush3.bf16.msra.mxu0 %v2298_v56  ;;  %1614 = vmatprep.subr.bf16.mxu1 %v2325_v43  ;;  %v2343_v56 = vld [vmem:[%s3212_s6 + $0x4] ss:$16 sps:$4 sm:$0xff]  }
 0x6ed   :  { %1659 = vmatprep.subr.bf16.mxu0 %v2304_v2 }
 0x6ef   :  { %1615 = vmatpush1.bf16.msra.mxu1 %v2323_v45 }
 0x6f0   :  { %1616 = vmatprep.subr.bf16.mxu1 %v2331_v47 }
 0x78f   :  { %v2199_v48 = vpop.f32.mrf.mxu0 }
 0x790   :  { %1233 = vrot.lane.b32.xlu0 %v2199_v48, %s2574_s8  ;;  %v2334_v48 = vld [vmem:[%s3212_s6 + $0x4c] ss:$16 sps:$4 sm:$0xff]  }
 0x791   :  { %v1134_v49 = vpop.f32.mrf.mxu0 }
 0x793   :  { %v2200_v50 = vpop.f32.mrf.mxu0 }
 0x794   :  { %1212 = vrot.lane.b32.xlu0 %v1134_v49, %s2573_s18  ;;  %1235 = vrot.lane.b32.xlu1 %v2200_v50, %s2574_s8  ;;  %v2329_v49 = vld [vmem:[%s3212_s6 + $0x40] ss:$16 sps:$4 sm:$0xff]   ;;  %v2332_v50 = vld [vmem:[%s3212_s6 + $0x48] ss:$16 sps:$4 sm:$0xff]  }
 0x795   :  { %v1137_v52 = vpop.f32.mrf.mxu0  ;;  %1617 = vmatpush1.bf16.msra.mxu1 %v2329_v49 }
 0x796   :  { %1618 = vmatprep.subr.bf16.mxu1 %v2337_v51 }
 0x798   :  { %1214 = vrot.lane.b32.xlu1 %v1137_v52, %s2573_s18  ;;  %v2340_v52 = vld [vmem:[%s3212_s6 + $0x2c] ss:$16 sps:$4 sm:$0xff]  }
 0x799   :  { %1619 = vmatpush1.bf16.msra.mxu1 %v2335_v53 }
 0x79a   :  { %1620 = vmatprep.subr.bf16.mxu1 %v2343_v56 }
 0x79e   :  { %v2205_v57 = vpop.f32.mrf.mxu1 }
 0x7a0   :  { %v1193_v58 = vpop.f32.mrf.mxu1 }
 0x7a1   :  { %1216 = vrot.lane.b32.xlu0 %v1193_v58, %s2573_s18  ;;  %v2341_v58 = vld [vmem:[%s3212_s6] ss:$16 sps:$4 sm:$0xff]  }
 0x7a2   :  { %v2206_v59 = vpop.f32.mrf.mxu1  ;;  %1621 = vmatpush1.bf16.msra.mxu1 %v2341_v58 }
 0x7a4   :  { %v1196_v60 = vpop.f32.mrf.mxu1 }
 0x7a5   :  { %1237 = vrot.lane.b32.xlu0 %v2205_v57, %s2574_s8  ;;  %1218 = vrot.lane.b32.xlu1 %v1196_v60, %s2573_s18  ;;  %v2346_v57 = vld [vmem:[%s3212_s6 + $0xc] ss:$16 sps:$4 sm:$0xff]  }
 0x7a9   :  { %1239 = vrot.lane.b32.xlu1 %v2206_v59, %s2574_s8  ;;  %v2344_v59 = vld [vmem:[%s3212_s6 + $0x8] ss:$16 sps:$4 sm:$0xff]  }
 0x802   :  { %v1234_v62 = vpop.permute.xlu0 %1233 }
 0x806   :  { %v1236_v63 = vpop.permute.xlu1 %1235  ;;  %v1213_v4 = vpop.permute.xlu0 %1212 }
 0x807   :  { %1225 = vst.msk [vmem:[#allocation2] sm:$0xff] %vm1224_vm4, %v1213_v4 }
 0x808   :  { %1246 = vst.msk [vmem:[#allocation2] sm:$0xff] %vm1245_vm5, %v1234_v62 }
 0x80a   :  { %v1215_v7 = vpop.permute.xlu1 %1214 }
 0x80b   :  { %1226 = vst.msk [vmem:[#allocation2 + $0x8] sm:$0xff] %vm1224_vm4, %v1215_v7 }
 0x80c   :  { %1247 = vst.msk [vmem:[#allocation2 + $0x8] sm:$0xff] %vm1245_vm5, %v1236_v63 }
 0x80f   :  { %v1250_v9 = vld [vmem:[#allocation2] sm:$0xff] }
 0x813   :  { %v1217_v8 = vpop.permute.xlu0 %1216  ;;  %v1251_v10 = vld [vmem:[#allocation2 + $0x8] sm:$0xff] }
 0x814   :  { %1227 = vst.msk [vmem:[#allocation2 + $0x10] sm:$0xff] %vm1224_vm4, %v1217_v8  ;;  %v1254_v0 = vpack.c.bf16 %v1251_v10, %v1250_v9 }
 0x816   :  { %2223 = vmatprep.mubr.bf16.mxu0 %v1254_v0 }
 0x817   :  { %v1219_v1 = vpop.permute.xlu1 %1218  ;;  %v1238_v12 = vpop.permute.xlu0 %1237 }
 0x818   :  { %1228 = vst.msk [vmem:[#allocation2 + $0x18] sm:$0xff] %vm1224_vm4, %v1219_v1 }
 0x819   :  { %1248 = vst.msk [vmem:[#allocation2 + $0x10] sm:$0xff] %vm1245_vm5, %v1238_v12 }
 0x81b   :  { %v1240_v13 = vpop.permute.xlu1 %1239 }
 0x81c   :  { %1249 = vst.msk [vmem:[#allocation2 + $0x18] sm:$0xff] %vm1245_vm5, %v1240_v13 }
 0x820   :  { %v1252_v5 = vld [vmem:[#allocation2 + $0x10] sm:$0xff] }
 0x823   :  { %v1253_v18 = vld [vmem:[#allocation2 + $0x18] sm:$0xff] }
 0x824   :  { %v1255_v19 = vpack.c.bf16 %v1253_v18, %v1252_v5 }
 0x826   :  { %2224 = vmatmul.mubr.bf16.vlgmr.msra.gmra.mxu0 %v1255_v19 }
 0x827   :  { %1691 = vmatprep.mubr.bf16.mxu0 %v2572_v36  ;;  %1660 = vmatpush1.bf16.msra.mxu0 %v2302_v23 }
 0x828   :  { %1661 = vmatprep.subr.bf16.mxu0 %v2310_v35  ;;  %v2353_v35 = vld [vmem:[%s3213_s7 + $0x60] sm:$0xff]  }
 0x82b   :  { %1662 = vmatpush1.bf16.msra.mxu0 %v2308_v15  ;;  %v2355_v15 = vld [vmem:[%s3213_s7 + $0x58] sm:$0xff]  }
 0x82c   :  { %1663 = vmatprep.subr.bf16.mxu0 %v2316_v16  ;;  %v2357_v16 = vld [vmem:[%s3213_s7 + $0x50] sm:$0xff]  }
 0x82f   :  { %1664 = vmatpush1.bf16.msra.mxu0 %v2314_v39  ;;  %v2359_v39 = vld [vmem:[%s3213_s7 + $0x48] sm:$0xff]  }
 0x830   :  { %1665 = vmatprep.subr.bf16.mxu0 %v2322_v41  ;;  %v2361_v41 = vld [vmem:[%s3213_s7 + $0x40] sm:$0xff]  }
 0x833   :  { %1666 = vmatpush1.bf16.msra.mxu0 %v2320_v24 }
 0x834   :  { %1667 = vmatprep.subr.bf16.mxu0 %v2328_v44 }
 0x837   :  { %1668 = vmatpush1.bf16.msra.mxu0 %v2326_v46 }
 0x838   :  { %1669 = vmatprep.subr.bf16.mxu0 %v2334_v48 }
 0x83b   :  { %1670 = vmatpush1.bf16.msra.mxu0 %v2332_v50 }
 0x83c   :  { %1671 = vmatprep.subr.bf16.mxu0 %v2340_v52 }
 0x83f   :  { %1672 = vmatpush1.bf16.msra.mxu0 %v2338_v55 }
 0x840   :  { %1673 = vmatprep.subr.bf16.mxu0 %v2346_v57 }
 0x843   :  { %1674 = vmatpush1.bf16.msra.mxu0 %v2344_v59 }
 0x8e6   :  { %v2225_v27 = vpop.f32.mrf.mxu0 }
 0x8e7   :  { %v3031_v6 = vadd.f32 %v2476_v22, %v2225_v27 }
 0x8e8   :  { %v1354_v26 = vpop.f32.mrf.mxu0 }
 0x8e9   :  { %v3026_v28 = vadd.f32 %v2475_v11, %v1354_v26  ;;  %v1376_v31 = vmul.f32 %v3031_v6, %v3031_v6 }
 0x8ea   :  { %v2226_v3 = vpop.f32.mrf.mxu0 }
 0x8eb   :  { %v1374_v61 = vmul.f32 %v3026_v28, %v3026_v28  ;;  %v3043_v30 = vadd.f32 %v2478_v29, %v2226_v3  ;;  %v2347_v29 = vld [vmem:[%s3213_s7 + $0x78] sm:$0xff]  }
 0x8ec   :  { %v1357_v25 = vpop.f32.mrf.mxu0  ;;  %2131 = vmatprep.subr.bf16.mxu1 %v2347_v29 }
 0x8ed   :  { %v3038_v14 = vadd.f32 %v2477_v54, %v1357_v25  ;;  %1378 = vadd.xlane.f32.xlu0 %v1374_v61  ;;  %v1377_v33 = vmul.f32 %v3043_v30, %v3043_v30 }
 0x8ef   :  { %v1375_v32 = vmul.f32 %v3038_v14, %v3038_v14 }
 0x8f1   :  { %1382 = vadd.xlane.f32.xlu0 %v1376_v31  ;;  %1380 = vadd.xlane.f32.xlu1 %v1375_v32  ;;  %v2348_v31 = vld [vmem:[%s3213_s7 + $0x38] sm:$0xff]   ;;  %v2349_v32 = vld [vmem:[%s3213_s7 + $0x70] sm:$0xff]  }
 0x8f5   :  { %1384 = vadd.xlane.f32.xlu0 %v1377_v33  ;;  %v2351_v33 = vld [vmem:[%s3213_s7 + $0x68] sm:$0xff]  }
 0x976   :  { %v1379_v60 = vpop.xlane.xlu0 %1378 }
 0x977   :  { %v1386_v62 = vmul.f32 0.0078125, %v1379_v60 }
 0x979   :  { %v1390_v63 = vadd.f32 1e-06, %v1386_v62 }
 0x97a   :  { %v1383_v4 = vpop.xlane.xlu0 %1382  ;;  %v1381_v7 = vpop.xlane.xlu1 %1380 }
 0x97b   :  { %v1387_v8 = vmul.f32 0.0078125, %v1381_v7  ;;  %2435 = vrsqrt.f32 %v1390_v63  ;;  %v1388_v9 = vmul.f32 0.0078125, %v1383_v4 }
 0x97d   :  { %v1391_v10 = vadd.f32 1e-06, %v1387_v8  ;;  %v1392_v12 = vadd.f32 1e-06, %v1388_v9 }
 0x97e   :  { %v1385_v0 = vpop.xlane.xlu0 %1384 }
 0x97f   :  { %v1389_v1 = vmul.f32 0.0078125, %v1385_v0  ;;  %2437 = vrsqrt.f32 %v1391_v10 }
 0x981   :  { %v1393_v13 = vadd.f32 1e-06, %v1389_v1 }
 0x983   :  { %2439 = vrsqrt.f32 %v1393_v13 }
 0x984   :  { %2441 = vrsqrt.f32 %v1392_v12 }
 0x988   :  { %v2436_v5 = vpop.eup %2435 }
 0x989   :  { %v1398_v18 = vmul.f32 %v2436_v5, %v3026_v28 }
 0x98b   :  { %v1408_v2 = vmul.f32 %v2040_v20, %v1398_v18 }
 0x98c   :  { %v2438_v19 = vpop.eup %2437 }
 0x98d   :  { %v1399_v21 = vmul.f32 %v2438_v19, %v3038_v14 }
 0x98f   :  { %v1409_v27 = vmul.f32 %v2040_v20, %v1399_v21 }
 0x990   :  { %v2440_v23 = vpop.eup %2439 }
 0x991   :  { %v2442_v26 = vpop.eup %2441  ;;  %v1412_v11 = vpack.c.bf16 %v1409_v27, %v1408_v2  ;;  %v1401_v3 = vmul.f32 %v2440_v23, %v3043_v30 }
 0x992   :  { %v1400_v22 = vmul.f32 %v2442_v26, %v3031_v6 }
 0x993   :  { %1639 = vmatmul.mubr.bf16.vlgmr.msra.gmra.mxu1 %v1412_v11  ;;  %1692 = vmatmul.mubr.bf16.vlgmr.msra.gmra.mxu0 %v1412_v11  ;;  %v1411_v61 = vmul.f32 %v2040_v20, %v1401_v3 }
 0x994   :  { %1648 = vmatprep.mubr.bf16.mxu1 %v2572_v36  ;;  %1701 = vmatprep.mubr.bf16.mxu0 %v2572_v36  ;;  %v1410_v25 = vmul.f32 %v2040_v20, %v1400_v22  ;;  %v2350_v36 = vld [vmem:[%s3213_s7 + $0x30] sm:$0xff]   ;;  %s2576_s7 = smov [#allocation9]  }
 0x995   :  { %2132 = vmatpush3.bf16.msra.mxu1 %v2348_v31  ;;  %s1970_s17 = sshll.u32 %s2576_s7, 4  ;;  %s1971_s17 = int_to_ptr.vmem [resolvable:$true] %s1970_s17 }
 0x996   :  { %v1413_v54 = vpack.c.bf16 %v1411_v61, %v1410_v25  ;;  %2133 = vmatprep.subr.bf16.mxu1 %v2349_v32  ;;  %s2539_s18 = scalar_lea.vmem %s1971_s17, 512  ;;  %p2544_p2 = scmp.lt.s32.totalorder %s1971_s17, %s1971_s17 }
 0x997   :  { %p2540_p1 = scmp.ne.s32.totalorder %s1971_s17, %s2539_s18  ;;  %p2545_p3 = scmp.lt.s32.totalorder %s2539_s18, %s2539_s18 }
 0x999   :  { %2134 = vmatpush3.bf16.msra.mxu1 %v2350_v36  ;;  %p2546_p4 = por %p2545_p3, %p2544_p2 }
 0x99a   :  { %2135 = vmatprep.subr.bf16.mxu1 %v2351_v33 }
 0x99b   :  { %1649 = vmatmul.mubr.bf16.gmra.mxu1 %v1413_v54  ;;  %1702 = vmatmul.mubr.bf16.gmra.mxu0 %v1413_v54  ;;  %p2547_p5 = pnand %p2546_p4, %p2540_p1 }
 0x99d   :  { %2136 = vmatpush3.bf16.msra.mxu1 %v2352_v34 }
 0x99e   :  { %2137 = vmatprep.subr.bf16.mxu1 %v2353_v35 }
 0x9a1   :  { %2138 = vmatpush3.bf16.msra.mxu1 %v2354_v37 }
 0x9a2   :  { %2139 = vmatprep.subr.bf16.mxu1 %v2355_v15 }
 0x9a5   :  { %2140 = vmatpush3.bf16.msra.mxu1 %v2356_v17 }
 0x9a6   :  { %2141 = vmatprep.subr.bf16.mxu1 %v2357_v16 }
 0x9a9   :  { %2142 = vmatpush3.bf16.msra.mxu1 %v2358_v38 }
 0x9aa   :  { %2143 = vmatprep.subr.bf16.mxu1 %v2359_v39 }
 0x9ad   :  { %2144 = vmatpush3.bf16.msra.mxu1 %v2360_v40 }
 0x9ae   :  { %2145 = vmatprep.subr.bf16.mxu1 %v2361_v41 }
 0x9b1   :  { %2146 = vmatpush3.bf16.msra.mxu1 %v2362_v42 }
 0xa53   :  { %v1640_v24 = vpop.f32.mrf.mxu1  ;;  %v1693_v7 = vpop.f32.mrf.mxu0 }
 0xa54   :  { %v2073_v43 = vmul.f32 -1.442695, %v1640_v24 }
 0xa55   :  { %v1642_v44 = vpop.f32.mrf.mxu1  ;;  %v1695_v1 = vpop.f32.mrf.mxu0 }
 0xa56   :  { %2443 = vpow2.f32 %v2073_v43  ;;  %v2074_v45 = vmul.f32 -1.442695, %v1642_v44 }
 0xa57   :  { %v1644_v46 = vpop.f32.mrf.mxu1  ;;  %v1697_v19 = vpop.f32.mrf.mxu0 }
 0xa58   :  { %2445 = vpow2.f32 %v2074_v45  ;;  %v2075_v47 = vmul.f32 -1.442695, %v1644_v46 }
 0xa59   :  { %v1646_v48 = vpop.f32.mrf.mxu1  ;;  %v1699_v2 = vpop.f32.mrf.mxu0 }
 0xa5a   :  { %2447 = vpow2.f32 %v2075_v47  ;;  %v2076_v49 = vmul.f32 -1.442695, %v1646_v48 }
 0xa5b   :  { %v3192_v50 = vpop.f32.mrf.mxu1  ;;  %v1703_v3 = vpop.f32.mrf.mxu0 }
 0xa5c   :  { %2449 = vpow2.f32 %v2076_v49  ;;  %v2077_v51 = vmul.f32 -1.442695, %v3192_v50 }
 0xa5d   :  { %v1652_v52 = vpop.f32.mrf.mxu1  ;;  %v1705_v32 = vpop.f32.mrf.mxu0 }
 0xa5e   :  { %2451 = vpow2.f32 %v2077_v51  ;;  %v2078_v53 = vmul.f32 -1.442695, %v1652_v52 }
 0xa5f   :  { %v1654_v55 = vpop.f32.mrf.mxu1  ;;  %v1707_v38 = vpop.f32.mrf.mxu0 }
 0xa60   :  { %2453 = vpow2.f32 %v2078_v53  ;;  %v2079_v56 = vmul.f32 -1.442695, %v1654_v55 }
 0xa61   :  { %v1656_v57 = vpop.f32.mrf.mxu1 }
 0xa62   :  { %2455 = vpow2.f32 %v2079_v56  ;;  %v2080_v58 = vmul.f32 -1.442695, %v1656_v57 }
 0xa63   :  { %v2444_v59 = vpop.eup %2443 }
 0xa64   :  { %2457 = vpow2.f32 %v2080_v58  ;;  %v1736_v62 = vadd.f32 1.0, %v2444_v59 }
 0xa65   :  { %v2446_v60 = vpop.eup %2445 }
 0xa66   :  { %v1737_v63 = vadd.f32 1.0, %v2446_v60 }
 0xa67   :  { %v2448_v4 = vpop.eup %2447 }
 0xa68   :  { %2459 = vrcp.f32 %v1737_v63  ;;  %v1738_v8 = vadd.f32 1.0, %v2448_v4 }
 0xa69   :  { %v2450_v9 = vpop.eup %2449  ;;  %2461 = vrcp.f32 %v1736_v62 }
 0xa6a   :  { %2463 = vrcp.f32 %v1738_v8  ;;  %v1739_v10 = vadd.f32 1.0, %v2450_v9 }
 0xa6b   :  { %v2452_v0 = vpop.eup %2451 }
 0xa6c   :  { %2465 = vrcp.f32 %v1739_v10  ;;  %v1740_v13 = vadd.f32 1.0, %v2452_v0 }
 0xa6d   :  { %v2454_v12 = vpop.eup %2453 }
 0xa6e   :  { %v1741_v5 = vadd.f32 1.0, %v2454_v12 }
 0xa6f   :  { %v2456_v18 = vpop.eup %2455 }
 0xa70   :  { %2467 = vrcp.f32 %v1741_v5  ;;  %v1742_v20 = vadd.f32 1.0, %v2456_v18 }
 0xa71   :  { %v2458_v21 = vpop.eup %2457  ;;  %2469 = vrcp.f32 %v1740_v13 }
 0xa72   :  { %2471 = vrcp.f32 %v1742_v20  ;;  %v1743_v23 = vadd.f32 1.0, %v2458_v21 }
 0xa74   :  { %2473 = vrcp.f32 %v1743_v23 }
 0xa75   :  { %v2460_v27 = vpop.eup %2459 }
 0xa76   :  { %v2462_v26 = vpop.eup %2461  ;;  %v1761_v22 = vmul.f32 %v2460_v27, %v1642_v44  ;;  %v1709_v44 = vpop.f32.mrf.mxu0 }
 0xa77   :  { %v2464_v11 = vpop.eup %2463  ;;  %v1760_v54 = vmul.f32 %v2462_v26, %v1640_v24 }
 0xa78   :  { %v1762_v61 = vmul.f32 %v2464_v11, %v1644_v46  ;;  %v1769_v36 = vmul.f32 %v1761_v22, %v1695_v1 }
 0xa79   :  { %v2466_v25 = vpop.eup %2465  ;;  %v1768_v35 = vmul.f32 %v1760_v54, %v1693_v7 }
 0xa7a   :  { %v1763_v29 = vmul.f32 %v2466_v25, %v1646_v48  ;;  %v1770_v31 = vmul.f32 %v1762_v61, %v1697_v19 }
 0xa7c   :  { %v1771_v33 = vmul.f32 %v1763_v29, %v1699_v2  ;;  %v1776_v16 = vpack.c.bf16 %v1770_v31, %v1768_v35 }
 0xa7d   :  { %v2468_v34 = vpop.eup %2467 }
 0xa7e   :  { %v2470_v37 = vpop.eup %2469  ;;  %v1777_v15 = vpack.c.bf16 %v1771_v33, %v1769_v36  ;;  %v1765_v39 = vmul.f32 %v2468_v34, %v1652_v52 }
 0xa7f   :  { %v2472_v17 = vpop.eup %2471  ;;  %v1764_v42 = vmul.f32 %v2470_v37, %v3192_v50 }
 0xa80   :  { %v1766_v40 = vmul.f32 %v2472_v17, %v1654_v55  ;;  %1940 = vmatprep.mubr.bf16.mxu1 %v1777_v15  ;;  %v1773_v45 = vmul.f32 %v1765_v39, %v1705_v32 }
 0xa81   :  { %v2474_v41 = vpop.eup %2473  ;;  %1941 = vmatmul.mubr.bf16.vlgmr.msra.gmra.mxu1 %v1776_v16  ;;  %v1772_v47 = vmul.f32 %v1764_v42, %v1703_v3 }
 0xa82   :  { %v1767_v24 = vmul.f32 %v2474_v41, %v1656_v57  ;;  %v1774_v43 = vmul.f32 %v1766_v40, %v1707_v38 }
 0xa84   :  { %v1775_v46 = vmul.f32 %v1767_v24, %v1709_v44  ;;  %v1778_v49 = vpack.c.bf16 %v1774_v43, %v1772_v47 }
 0xa86   :  { %v1779_v48 = vpack.c.bf16 %v1775_v46, %v1773_v45 }
 0xa88   :  { %1948 = vmatprep.mubr.bf16.mxu1 %v1779_v48 }
 0xa89   :  { %1949 = vmatmul.mubr.bf16.gmra.mxu1 %v1778_v49 }
 0xb41   :  { %v2147_v51 = vpop.f32.mrf.mxu1 }
 0xb43   :  { %v2148_v53 = vpop.f32.mrf.mxu1 }
 0xb44   :  { %v2149_v56 = vadd.f32 %v2148_v53, %v2147_v51 }
 0xb45   :  { %v2150_v52 = vpop.f32.mrf.mxu1 }
 0xb46   :  { %v1957_v55 = vadd.f32 %v2149_v56, %v3026_v28 }
 0xb47   :  { %v2151_v58 = vpop.f32.mrf.mxu1 }
 0xb48   :  { %1961 = vst [vmem:[#allocation9] sm:$0xff] %v1957_v55  ;;  %v2152_v50 = vadd.f32 %v2151_v58, %v2150_v52 }
 0xb49   :  { %v2153_v59 = vpop.f32.mrf.mxu1 }
 0xb4a   :  { %v1958_v57 = vadd.f32 %v2152_v50, %v3038_v14 }
 0xb4b   :  { %v2154_v60 = vpop.f32.mrf.mxu1 }
 0xb4c   :  { %1962 = vst [vmem:[#allocation9 + $0x8] sm:$0xff] %v1958_v57  ;;  %v2155_v62 = vadd.f32 %v2154_v60, %v2153_v59 }
 0xb4d   :  { %v2156_v63 = vpop.f32.mrf.mxu1 }
 0xb4e   :  { %v1959_v4 = vadd.f32 %v2155_v62, %v3031_v6 }
 0xb4f   :  { %v2157_v7 = vpop.f32.mrf.mxu1 }
 0xb50   :  { %1963 = vst [vmem:[#allocation9 + $0x10] sm:$0xff] %v1959_v4  ;;  %v2158_v8 = vadd.f32 %v2157_v7, %v2156_v63 }
 0xb52   :  { %v1960_v9 = vadd.f32 %v2158_v8, %v3043_v30 }
 0xb54   :  { %1964 = vst [vmem:[#allocation9 + $0x18] sm:$0xff] %v1960_v9 }
 0xb55   :  { %2550 = shalt.err (!%p2547_p5)
}
 0xb56   :  { %1976 = dma.vmem_to_hbm [thread:$0]  %s1971_s17, 512, %s3216_s10, [#allocation5], %s2570_s2, %s2570_s2, %s2571_s28  }
 0xb57   :  { %2563 = dma.done.wait [#allocation5], 512  }
 0xb58   :  { %2564 = vsyncadd [#allocation5], 4294966784 }
 0xb59   :  { %1980 = vsyncpa [#allocation4], 1 }
 0xb5a   :  { %1981 = vsyncpa [#allocation7], 1 }
 0xb5b   :  { %1982 = vsyncpa [#allocation5], 1 }

</bundles_post_ra>
